<compile_context>
chip_gen: v6e
topology: v6e:2x2x1
jax: 0.10.0
libtpu: 0.0.40
codegen_flags: <defaults>
</compile_context>

<pallas_src>
import functools

import jax
import jax.numpy as jnp
from jax.experimental import pallas as pl
from jax.experimental.pallas import tpu as pltpu

NEG_INF = -1000000.0
LN_EPS = 1e-5

_VMEM_LIMIT_CACHE = None


# ---------------------------------------------------------------------------
# small helpers
# ---------------------------------------------------------------------------
def _round_up(x, m):
    return ((x + m - 1) // m) * m


def _vmem_limit_bytes():
    """Generation-aware scoped-VMEM limit (v5e/v6e: 128 MiB physical, v7x: 64 MiB)."""
    global _VMEM_LIMIT_CACHE
    if _VMEM_LIMIT_CACHE is None:
        limit = 48 * 1024 * 1024
        try:
            cap = getattr(pltpu.get_tpu_info(), "vmem_capacity_bytes", None)
            if cap:
                limit = max(32 * 1024 * 1024, (int(cap) * 3) // 4)
        except Exception:
            pass
        _VMEM_LIMIT_CACHE = limit
    return _VMEM_LIMIT_CACHE


def _cparams(n_grid_dims):
    return pltpu.CompilerParams(
        dimension_semantics=("parallel",) * n_grid_dims,
        vmem_limit_bytes=_vmem_limit_bytes())


def _row_tiling(T, target=512):
    """Token-dim tiling with minimal padding waste and >=2 grid steps (v7x megacore)."""
    n = max(1, -(-T // target))
    if T >= 16:
        n = max(n, 2)
    tile = _round_up(-(-T // n), 8)
    n = -(-T // tile)
    return tile, n, tile * n


def _choose_window_block(Bw, period, target):
    """Pick WB | Bw with WB | period or period | WB so the pad-mask tiles cleanly."""
    cands = {d for d in range(1, period + 1) if period % d == 0}
    rep = Bw // period
    cands |= {period * m for m in range(1, rep + 1) if rep % m == 0}
    good = sorted(c for c in cands if c <= target)
    pref = [c for c in good if Bw // c >= 2]      # keep >=2 grid steps when possible
    if pref:
        return pref[-1]
    return good[-1] if good else min(cands)


# ---------------------------------------------------------------------------
# Kernel 1: fused LN1 + QKV + windowed multi-head attention + proj + residual
# ---------------------------------------------------------------------------
def _attn_block_kernel(x_ref, g_ref, b_ref, qkvw_ref, qkvb_ref,
                       projw_ref, projb_ref, bias_ref, o_ref, *, num_heads):
    WB, N, C = x_ref.shape
    hd = C // num_heads

    x = x_ref[...]
    xf = x.astype(jnp.float32)

    # --- LayerNorm (norm1), fused: per-token so it commutes with the partition ---
    mean = jnp.mean(xf, axis=-1, keepdims=True)
    xc = xf - mean
    var = jnp.mean(xc * xc, axis=-1, keepdims=True)
    xn = xc * jax.lax.rsqrt(var + LN_EPS)
    xn = xn * g_ref[...].astype(jnp.float32) + b_ref[...].astype(jnp.float32)

    # --- QKV projection (1/sqrt(hd) scale is pre-folded into the q columns) ---
    xn2 = xn.reshape(WB * N, C).astype(x.dtype)
    qkv = jnp.dot(xn2, qkvw_ref[...], preferred_element_type=jnp.float32)
    qkv = (qkv + qkvb_ref[...].astype(jnp.float32)).reshape(WB, N, 3 * C)

    bias = bias_ref[...].astype(jnp.float32)          # (WBm, nh, N, N), WBm in {1, WB}

    # --- per-head attention; head split done on VMEM values (no HBM transpose) ---
    heads = []
    for h in range(num_heads):
        q = qkv[:, :, h * hd:(h + 1) * hd].astype(x.dtype)
        k = qkv[:, :, C + h * hd:C + (h + 1) * hd].astype(x.dtype)
        v = qkv[:, :, 2 * C + h * hd:2 * C + (h + 1) * hd].astype(x.dtype)
        s = jnp.einsum("wqd,wkd->wqk", q, k, preferred_element_type=jnp.float32)
        s = s + bias[:, h]
        m = jnp.max(s, axis=-1, keepdims=True)
        p = jnp.exp(s - m)
        l = jnp.sum(p, axis=-1, keepdims=True)
        o = jnp.einsum("wqk,wkd->wqd", p.astype(x.dtype), v,
                       preferred_element_type=jnp.float32)
        # normalize the (N, hd) output instead of the (N, N) probs; EUP reciprocal
        heads.append(o * pl.reciprocal(l, approx=True))

    attn = jnp.concatenate(heads, axis=-1)            # (WB, N, C) lane-dense

    # --- output projection + residual (window layout == shortcut layout) ---
    y = jnp.dot(attn.reshape(WB * N, C).astype(x.dtype), projw_ref[...],
                preferred_element_type=jnp.float32)
    y = y + projb_ref[...].astype(jnp.float32) + xf.reshape(WB * N, C)
    o_ref[...] = y.reshape(WB, N, C).astype(o_ref.dtype)


def fused_window_attention(xw, rel_bias, attn_mask, params, num_heads, wb_target=16):
    """xw: (Bw, N, C) raw (un-normalized) window tokens; returns x + proj(attn(LN(x)))."""
    Bw, N, C = xw.shape
    nh = num_heads
    hd = C // nh
    scale = hd ** (-0.5)

    # fold the qk scale into the q slice of the qkv projection (zero in-kernel cost)
    qkv_w = params["qkv_w"].at[:, :C].multiply(scale)
    qkv_b = params["qkv_b"].at[:C].multiply(scale)

    wb_target = max(1, min(wb_target, max(1, 4096 // N)))   # keep score tiles sane
    period = attn_mask.shape[0] if attn_mask is not None else 1
    WB = _choose_window_block(Bw, period, wb_target)

    # pre-combine relative-position bias and pad mask into a single per-step stream
    if attn_mask is None:
        bias_arr = rel_bias[None]                             # (1, nh, N, N)
        WBm, nblk = 1, 1
    else:
        nG = attn_mask.shape[0]
        per_group = rel_bias[None] + attn_mask[:, None]       # (nG, nh, N, N)
        if WB <= nG:
            bias_arr, WBm, nblk = per_group, WB, nG // WB
        else:
            bias_arr = jnp.tile(per_group, (WB // nG, 1, 1, 1))
            WBm, nblk = WB, 1
    bias_arr = bias_arr.astype(jnp.float32)

    kern = functools.partial(_attn_block_kernel, num_heads=nh)
    return pl.pallas_call(
        kern,
        out_shape=jax.ShapeDtypeStruct((Bw, N, C), xw.dtype),
        grid_spec=pl.GridSpec(
            grid=(Bw // WB,),
            in_specs=[
                pl.BlockSpec((WB, N, C), lambda b: (b, 0, 0)),
                pl.BlockSpec((1, C), lambda b: (0, 0)),
                pl.BlockSpec((1, C), lambda b: (0, 0)),
                # TODO(synk): pipeline_mode=pl.Buffered(1) on these resident weight
                # blocks would halve their VMEM on v7x; left default for portability.
                pl.BlockSpec((C, 3 * C), lambda b: (0, 0)),
                pl.BlockSpec((1, 3 * C), lambda b: (0, 0)),
                pl.BlockSpec((C, C), lambda b: (0, 0)),
                pl.BlockSpec((1, C), lambda b: (0, 0)),
                pl.BlockSpec((WBm, nh, N, N), lambda b, nblk=nblk: (b % nblk, 0, 0, 0)),
            ],
            out_specs=pl.BlockSpec((WB, N, C), lambda b: (b, 0, 0))),
        compiler_params=_cparams(1),
    )(xw, params["norm1_g"].reshape(1, C), params["norm1_b"].reshape(1, C),
      qkv_w, qkv_b.reshape(1, 3 * C),
      params["proj_w"], params["proj_b"].reshape(1, C), bias_arr)


# ---------------------------------------------------------------------------
# Kernel 2: fused LN2 + MLP (fc1 -> GELU -> fc2) + residual
# ---------------------------------------------------------------------------
def _ln_mlp_kernel(x_ref, g_ref, b_ref, w1_ref, b1_ref, w2_ref, b2_ref, o_ref):
    x = x_ref[...]
    xf = x.astype(jnp.float32)
    mean = jnp.mean(xf, axis=-1, keepdims=True)
    xc = xf - mean
    var = jnp.mean(xc * xc, axis=-1, keepdims=True)
    xn = xc * jax.lax.rsqrt(var + LN_EPS)
    xn = xn * g_ref[...].astype(jnp.float32) + b_ref[...].astype(jnp.float32)
    h = jnp.dot(xn.astype(x.dtype), w1_ref[...], preferred_element_type=jnp.float32)
    # exact erf GELU (torch nn.GELU default); tanh-approx would shift work to the EUP
    h = jax.nn.gelu(h + b1_ref[...].astype(jnp.float32), approximate=False)
    y = jnp.dot(h.astype(x.dtype), w2_ref[...], preferred_element_type=jnp.float32)
    y = y + b2_ref[...].astype(jnp.float32) + xf
    o_ref[...] = y.astype(o_ref.dtype)


def ln_mlp_residual_pallas(x2d, params, tile_target=512):
    T, C = x2d.shape
    Hf = params["fc1_w"].shape[1]
    tile, nblk, Tp = _row_tiling(T, tile_target)
    xp = jnp.pad(x2d, ((0, Tp - T), (0, 0))) if Tp != T else x2d
    out = pl.pallas_call(
        _ln_mlp_kernel,
        out_shape=jax.ShapeDtypeStruct((Tp, C), x2d.dtype),
        grid_spec=pl.GridSpec(
            grid=(nblk,),
            in_specs=[pl.BlockSpec((tile, C), lambda i: (i, 0)),
                      pl.BlockSpec((1, C), lambda i: (0, 0)),
                      pl.BlockSpec((1, C), lambda i: (0, 0)),
                      pl.BlockSpec((C, Hf), lambda i: (0, 0)),
                      pl.BlockSpec((1, Hf), lambda i: (0, 0)),
                      pl.BlockSpec((Hf, C), lambda i: (0, 0)),
                      pl.BlockSpec((1, C), lambda i: (0, 0))],
            out_specs=pl.BlockSpec((tile, C), lambda i: (i, 0))),
        compiler_params=_cparams(1),
    )(xp, params["norm2_g"].reshape(1, C), params["norm2_b"].reshape(1, C),
      params["fc1_w"], params["fc1_b"].reshape(1, Hf),
      params["fc2_w"], params["fc2_b"].reshape(1, C))
    return out[:T]


# ---------------------------------------------------------------------------
# JAX glue shared by the Pallas path and the pure-JAX reference
# ---------------------------------------------------------------------------
def _partition_sda(x, G):
    B, Hp, Wp, C = x.shape
    x = x.reshape(B, Hp // G, G, Wp // G, G, C).transpose(0, 1, 3, 2, 4, 5)
    return x.reshape(B * (Hp // G) * (Wp // G), G * G, C)


def _merge_sda(xw, B, Hp, Wp, G, C):
    x = xw.reshape(B, Hp // G, Wp // G, G, G, C).transpose(0, 1, 3, 2, 4, 5)
    return x.reshape(B, Hp, Wp, C)


def _partition_lda(x, I):
    B, Hp, Wp, C = x.shape
    Gh, Gw = Hp // I, Wp // I
    x = x.reshape(B, Gh, I, Gw, I, C).transpose(0, 2, 4, 1, 3, 5)
    return x.reshape(B * I * I, Gh * Gw, C)


def _merge_lda(xw, B, Hp, Wp, I, C):
    Gh, Gw = Hp // I, Wp // I
    x = xw.reshape(B, I, I, Gh, Gw, C).transpose(0, 3, 1, 4, 2, 5)
    return x.reshape(B, Hp, Wp, C)


def _build_attn_mask(Hp, Wp, pad_b, pad_r, lsda_flag, group_size, interval, nG, N):
    if pad_r == 0 and pad_b == 0:
        return None
    mm = jnp.zeros((1, Hp, Wp, 1), jnp.float32)
    if pad_b > 0:
        mm = mm.at[:, -pad_b:, :, :].set(-1.0)
    if pad_r > 0:
        mm = mm.at[:, :, -pad_r:, :].set(-1.0)
    if lsda_flag == 0:
        m = _partition_sda(mm, group_size).reshape(nG, 1, N)
    else:
        m = _partition_lda(mm, interval).reshape(nG, 1, N)
    return jnp.broadcast_to(
        jnp.where(m < 0, jnp.float32(NEG_INF), jnp.float32(0.0)), (nG, N, N))


def _dynamic_pos_bias(params, biases):
    # TODO(synk): DynamicPosBias MLP (2-/8-wide features) and the relative-position
    # gather stay in plain JAX -- far below the TPU (8,128) tile granularity.
    def ln(x, g, b):
        m = x.mean(-1, keepdims=True)
        v = ((x - m) ** 2).mean(-1, keepdims=True)
        return (x - m) * jax.lax.rsqrt(v + LN_EPS) * g + b

    p = biases @ params["pos_proj_w"] + params["pos_proj_b"]
    p = jax.nn.relu(ln(p, params["pos1_ln_g"], params["pos1_ln_b"])) @ params["pos1_w"] + params["pos1_b"]
    p = jax.nn.relu(ln(p, params["pos2_ln_g"], params["pos2_ln_b"])) @ params["pos2_w"] + params["pos2_b"]
    p = jax.nn.relu(ln(p, params["pos3_ln_g"], params["pos3_ln_b"])) @ params["pos3_w"] + params["pos3_b"]
    return p  # ((2Gh-1)*(2Gw-1), num_heads)


def _relative_position_bias(params, Gh, Gw, num_heads):
    pbh = jnp.arange(1 - Gh, Gh, dtype=jnp.float32)
    pbw = jnp.arange(1 - Gw, Gw, dtype=jnp.float32)
    biases = jnp.stack(jnp.meshgrid(pbh, pbw, indexing="ij")).reshape(2, -1).T
    ch, cw = jnp.arange(Gh), jnp.arange(Gw)
    coords = jnp.stack(jnp.meshgrid(ch, cw, indexing="ij")).reshape(2, -1)
    rel = (coords[:, :, None] - coords[:, None, :]).transpose(1, 2, 0)
    idx = (rel[..., 0] + Gh - 1) * (2 * Gw - 1) + (rel[..., 1] + Gw - 1)
    pos = _dynamic_pos_bias(params, biases)
    rpb = pos[idx.reshape(-1)].reshape(Gh * Gw, Gh * Gw, num_heads)
    return rpb.transpose(2, 0, 1)  # (nh, N, N)


def _layernorm_ref(x, g, b):
    m = jnp.mean(x, axis=-1, keepdims=True)
    v = jnp.mean((x - m) ** 2, axis=-1, keepdims=True)
    return (x - m) * jax.lax.rsqrt(v + LN_EPS) * g + b


def attention_ref(xw, Gh, Gw, attn_mask, params, num_heads):
    Bw, N, C = xw.shape
    hd = C // num_heads
    scale = hd ** (-0.5)
    qkv = xw @ params["qkv_w"] + params["qkv_b"]
    qkv = qkv.reshape(Bw, N, 3, num_heads, hd).transpose(2, 0, 3, 1, 4)
    q, k, v = qkv[0] * scale, qkv[1], qkv[2]
    attn = jnp.einsum("bhqd,bhkd->bhqk", q, k)
    attn = attn + _relative_position_bias(params, Gh, Gw, num_heads)[None]
    if attn_mask is not None:
        nG = attn_mask.shape[0]
        attn = attn.reshape(Bw // nG, nG, num_heads, N, N) + attn_mask[None, :, None]
        attn = attn.reshape(Bw, num_heads, N, N)
    attn = jax.nn.softmax(attn, axis=-1)
    out = jnp.einsum("bhqk,bhkd->bhqd", attn, v)
    out = out.transpose(0, 2, 1, 3).reshape(Bw, N, C)
    return out @ params["proj_w"] + params["proj_b"]


# ---------------------------------------------------------------------------
# CrossFormerBlock forward (drop / attn_drop / drop_path = 0 -> identity)
# ---------------------------------------------------------------------------
def crossformer_block(x, params, H, W, *, num_heads, group_size, interval,
                      lsda_flag, use_pallas=True):
    B, L, C = x.shape
    assert L == H * W
    if min(H, W) <= group_size:
        lsda_flag = 0
        group_size = min(H, W)

    if not use_pallas:
        return _crossformer_block_ref(x, params, H, W, num_heads=num_heads,
                                      group_size=group_size, interval=interval,
                                      lsda_flag=lsda_flag)

    size_div = interval if lsda_flag == 1 else group_size
    pad_r = (size_div - W % size_div) % size_div
    pad_b = (size_div - H % size_div) % size_div

    # Window-partition the RAW input: LN1 is per-token so it commutes with the
    # partition and is fused into the attention kernel. Padded keys are masked to
    # -1e6 (exp underflows to 0) and padded rows are sliced off after the merge,
    # so the result matches the reference ordering (LN -> pad -> partition).
    xs = jnp.pad(x.reshape(B, H, W, C), ((0, 0), (0, pad_b), (0, pad_r), (0, 0)))
    Hp, Wp = H + pad_b, W + pad_r

    if lsda_flag == 0:                       # SDA: G x G windows
        G = group_size
        Gh = Gw = G
        nG = (Hp // G) * (Wp // G)
        xw = _partition_sda(xs, G)
    else:                                    # LDA: interval-strided windows
        I = interval
        Gh, Gw = Hp // I, Wp // I
        nG = I * I
        xw = _partition_lda(xs, I)
    N = Gh * Gw

    attn_mask = _build_attn_mask(Hp, Wp, pad_b, pad_r, lsda_flag, group_size,
                                 interval, nG, N)
    rel_bias = _relative_position_bias(params, Gh, Gw, num_heads).astype(jnp.float32)

    # fused kernel: LN1 + QKV + per-head softmax attention + proj + residual
    yw = fused_window_attention(xw, rel_bias, attn_mask, params, num_heads)

    if lsda_flag == 0:
        ys = _merge_sda(yw, B, Hp, Wp, group_size, C)
    else:
        ys = _merge_lda(yw, B, Hp, Wp, interval, C)
    x1 = ys[:, :H, :W, :].reshape(B, L, C)   # == shortcut + attention output

    # fused kernel: LN2 + fc1 + GELU + fc2 + residual
    return ln_mlp_residual_pallas(x1.reshape(B * L, C), params).reshape(B, L, C)


def _crossformer_block_ref(x, params, H, W, *, num_heads, group_size, interval,
                           lsda_flag):
    B, L, C = x.shape
    shortcut = x
    xn = _layernorm_ref(x, params["norm1_g"], params["norm1_b"])
    xs = xn.reshape(B, H, W, C)
    size_div = interval if lsda_flag == 1 else group_size
    pad_r = (size_div - W % size_div) % size_div
    pad_b = (size_div - H % size_div) % size_div
    xs = jnp.pad(xs, ((0, 0), (0, pad_b), (0, pad_r), (0, 0)))
    Hp, Wp = H + pad_b, W + pad_r
    if lsda_flag == 0:
        G = group_size
        Gh = Gw = G
        nG = (Hp // G) * (Wp // G)
        xw = _partition_sda(xs, G)
    else:
        I = interval
        Gh, Gw = Hp // I, Wp // I
        nG = I * I
        xw = _partition_lda(xs, I)
    N = Gh * Gw
    attn_mask = _build_attn_mask(Hp, Wp, pad_b, pad_r, lsda_flag, group_size,
                                 interval, nG, N)
    yw = attention_ref(xw, Gh, Gw, attn_mask, params, num_heads)
    if lsda_flag == 0:
        ys = _merge_sda(yw, B, Hp, Wp, group_size, C)
    else:
        ys = _merge_lda(yw, B, Hp, Wp, interval, C)
    x1 = shortcut + ys[:, :H, :W, :].reshape(B, L, C)
    xn2 = _layernorm_ref(x1, params["norm2_g"], params["norm2_b"])
    h = jax.nn.gelu(xn2 @ params["fc1_w"] + params["fc1_b"], approximate=False)
    return x1 + (h @ params["fc2_w"] + params["fc2_b"])


# ---------------------------------------------------------------------------
# Parameters (weights stored as (in, out) -- transpose of torch nn.Linear.weight)
# ---------------------------------------------------------------------------
def init_params(key, dim, num_heads, mlp_ratio=4.0, dtype=jnp.float32):
    hidden = int(dim * mlp_ratio)
    pos_dim = (dim // 4) // 4
    ks = list(jax.random.split(key, 24))

    def nxt():
        return ks.pop()

    def lin(shape):
        bound = 1.0 / (shape[0] ** 0.5)
        return jax.random.uniform(nxt(), shape, dtype, -bound, bound)

    def vec(n, scale=0.02):
        return scale * jax.random.normal(nxt(), (n,), dtype)

    return {
        "norm1_g": 1.0 + 0.1 * jax.random.normal(nxt(), (dim,), dtype),
        "norm1_b": 0.1 * jax.random.normal(nxt(), (dim,), dtype),
        "qkv_w": lin((dim, 3 * dim)), "qkv_b": vec(3 * dim),
        "proj_w": lin((dim, dim)), "proj_b": vec(dim),
        "pos_proj_w": lin((2, pos_dim)), "pos_proj_b": vec(pos_dim),
        "pos1_ln_g": jnp.ones((pos_dim,), dtype), "pos1_ln_b": jnp.zeros((pos_dim,), dtype),
        "pos1_w": lin((pos_dim, pos_dim)), "pos1_b": vec(pos_dim),
        "pos2_ln_g": jnp.ones((pos_dim,), dtype), "pos2_ln_b": jnp.zeros((pos_dim,), dtype),
        "pos2_w": lin((pos_dim, pos_dim)), "pos2_b": vec(pos_dim),
        "pos3_ln_g": jnp.ones((pos_dim,), dtype), "pos3_ln_b": jnp.zeros((pos_dim,), dtype),
        "pos3_w": lin((pos_dim, num_heads)), "pos3_b": vec(num_heads),
        "norm2_g": 1.0 + 0.1 * jax.random.normal(nxt(), (dim,), dtype),
        "norm2_b": 0.1 * jax.random.normal(nxt(), (dim,), dtype),
        "fc1_w": lin((dim, hidden)), "fc1_b": vec(hidden),
        "fc2_w": lin((hidden, dim)), "fc2_b": vec(dim),
    }


if __name__ == "__main__":
    key = jax.random.PRNGKey(0)
    configs = [
        # SDA, no spatial padding
        dict(B=2, H=8, W=8, dim=32, num_heads=4, group_size=4, interval=8, lsda_flag=0),
        # SDA with right/bottom padding -> exercises the pad-mask path
        dict(B=2, H=10, W=10, dim=32, num_heads=4, group_size=4, interval=8, lsda_flag=0),
        # LDA (long-distance) window partition
        dict(B=2, H=8, W=8, dim=32, num_heads=4, group_size=4, interval=4, lsda_flag=1),
    ]
    for cfg in configs:
        key, kx, kp = jax.random.split(key, 3)
        B, H, W, dim = cfg["B"], cfg["H"], cfg["W"], cfg["dim"]
        x = jax.random.normal(kx, (B, H * W, dim), dtype=jnp.float32)
        params = init_params(kp, dim, cfg["num_heads"])
        fwd = functools.partial(
            crossformer_block, H=H, W=W, num_heads=cfg["num_heads"],
            group_size=cfg["group_size"], interval=cfg["interval"],
            lsda_flag=cfg["lsda_flag"])
        out = jax.block_until_ready(fwd(x, params, use_pallas=True))
        ref = jax.block_until_ready(fwd(x, params, use_pallas=False))
        assert out.shape == (B, H * W, dim)
        err = float(jnp.max(jnp.abs(out - ref)))
        assert jnp.allclose(out, ref, atol=5e-3, rtol=5e-3), \
            f"{cfg}: max abs diff {err}"
    print("KERNEL_OK")
</pallas_src>

<mosaic_0001>
module attributes {stable_mosaic.version = 11 : i64} {
  func.func @_attn_block_kernel(%arg0: i32, %arg1: memref<4x16x32xf32, #tpu.memory_space<vmem>>, %arg2: memref<1x32xf32, #tpu.memory_space<vmem>>, %arg3: memref<1x32xf32, #tpu.memory_space<vmem>>, %arg4: memref<32x96xf32, #tpu.memory_space<vmem>>, %arg5: memref<1x96xf32, #tpu.memory_space<vmem>>, %arg6: memref<32x32xf32, #tpu.memory_space<vmem>>, %arg7: memref<1x32xf32, #tpu.memory_space<vmem>>, %arg8: memref<1x4x16x16xf32, #tpu.memory_space<vmem>>, %arg9: memref<4x16x32xf32, #tpu.memory_space<vmem>>) attributes {dimension_semantics = [#tpu.dimension_semantics<parallel>], iteration_bounds = array<i64: 2>, scalar_prefetch = 0 : i64, scratch_operands = 0 : i64, tpu.core_type = #tpu.core_type<tc>, window_params = [{transform_indices = @transform_0, window_bounds = array<i64: 4, 16, 32>}, {pipeline_mode = #tpu.pipeline_mode<synchronous>, transform_indices = @transform_1, window_bounds = array<i64: 1, 32>}, {pipeline_mode = #tpu.pipeline_mode<synchronous>, transform_indices = @transform_2, window_bounds = array<i64: 1, 32>}, {pipeline_mode = #tpu.pipeline_mode<synchronous>, transform_indices = @transform_3, window_bounds = array<i64: 32, 96>}, {pipeline_mode = #tpu.pipeline_mode<synchronous>, transform_indices = @transform_4, window_bounds = array<i64: 1, 96>}, {pipeline_mode = #tpu.pipeline_mode<synchronous>, transform_indices = @transform_5, window_bounds = array<i64: 32, 32>}, {pipeline_mode = #tpu.pipeline_mode<synchronous>, transform_indices = @transform_6, window_bounds = array<i64: 1, 32>}, {transform_indices = @transform_7, window_bounds = array<i64: 1, 4, 16, 16>}, {transform_indices = @transform_8, window_bounds = array<i64: 4, 16, 32>}]} {
    %c0 = arith.constant 0 : index
    %c0_0 = arith.constant 0 : index
    %c0_1 = arith.constant 0 : index
    %0 = vector.load %arg1[%c0, %c0_0, %c0_1] : memref<4x16x32xf32, #tpu.memory_space<vmem>>, vector<4x16x32xf32>
    %cst = arith.constant dense<0.000000e+00> : vector<4x16xf32>
    %1 = vector.multi_reduction <add>, %0, %cst [2] : vector<4x16x32xf32> to vector<4x16xf32>
    %2 = vector.shape_cast %1 : vector<4x16xf32> to vector<4x16x1xf32>
    %cst_2 = arith.constant 3.200000e+01 : f32
    %3 = vector.broadcast %cst_2 : f32 to vector<4x16x1xf32>
    %4 = arith.divf %2, %3 : vector<4x16x1xf32>
    %5 = vector.broadcast %4 : vector<4x16x1xf32> to vector<4x16x32xf32>
    %6 = arith.subf %0, %5 : vector<4x16x32xf32>
    %7 = arith.mulf %6, %6 : vector<4x16x32xf32>
    %cst_3 = arith.constant dense<0.000000e+00> : vector<4x16xf32>
    %8 = vector.multi_reduction <add>, %7, %cst_3 [2] : vector<4x16x32xf32> to vector<4x16xf32>
    %9 = vector.shape_cast %8 : vector<4x16xf32> to vector<4x16x1xf32>
    %cst_4 = arith.constant 3.200000e+01 : f32
    %10 = vector.broadcast %cst_4 : f32 to vector<4x16x1xf32>
    %11 = arith.divf %9, %10 : vector<4x16x1xf32>
    %cst_5 = arith.constant 9.99999974E-6 : f32
    %12 = vector.broadcast %cst_5 : f32 to vector<4x16x1xf32>
    %13 = arith.addf %11, %12 : vector<4x16x1xf32>
    %14 = math.rsqrt %13 : vector<4x16x1xf32>
    %15 = vector.broadcast %14 : vector<4x16x1xf32> to vector<4x16x32xf32>
    %16 = arith.mulf %6, %15 : vector<4x16x32xf32>
    %c0_6 = arith.constant 0 : index
    %c0_7 = arith.constant 0 : index
    %17 = vector.load %arg2[%c0_6, %c0_7] : memref<1x32xf32, #tpu.memory_space<vmem>>, vector<1x32xf32>
    %18 = vector.shape_cast %17 : vector<1x32xf32> to vector<1x1x32xf32>
    %19 = vector.broadcast %18 : vector<1x1x32xf32> to vector<4x16x32xf32>
    %20 = arith.mulf %16, %19 : vector<4x16x32xf32>
    %c0_8 = arith.constant 0 : index
    %c0_9 = arith.constant 0 : index
    %21 = vector.load %arg3[%c0_8, %c0_9] : memref<1x32xf32, #tpu.memory_space<vmem>>, vector<1x32xf32>
    %22 = vector.shape_cast %21 : vector<1x32xf32> to vector<1x1x32xf32>
    %23 = vector.broadcast %22 : vector<1x1x32xf32> to vector<4x16x32xf32>
    %24 = arith.addf %20, %23 : vector<4x16x32xf32>
    %25 = vector.shape_cast %24 : vector<4x16x32xf32> to vector<64x32xf32>
    %c0_10 = arith.constant 0 : index
    %c0_11 = arith.constant 0 : index
    %26 = vector.load %arg4[%c0_10, %c0_11] : memref<32x96xf32, #tpu.memory_space<vmem>>, vector<32x96xf32>
    %cst_12 = arith.constant dense<0.000000e+00> : vector<64x96xf32>
    %27 = tpu.matmul %25, %26, %cst_12 {dimension_numbers = #tpu.dot_dimension_numbers<[1], [0], [0], [1], [0, 0, 1, 1], [], []>} : vector<64x32xf32>, vector<32x96xf32>, vector<64x96xf32> -> vector<64x96xf32>
    %c0_13 = arith.constant 0 : index
    %c0_14 = arith.constant 0 : index
    %28 = vector.load %arg5[%c0_13, %c0_14] : memref<1x96xf32, #tpu.memory_space<vmem>>, vector<1x96xf32>
    %29 = vector.broadcast %28 : vector<1x96xf32> to vector<64x96xf32>
    %30 = arith.addf %27, %29 : vector<64x96xf32>
    %31 = vector.shape_cast %30 : vector<64x96xf32> to vector<4x16x96xf32>
    %c0_15 = arith.constant 0 : index
    %c0_16 = arith.constant 0 : index
    %c0_17 = arith.constant 0 : index
    %c0_18 = arith.constant 0 : index
    %32 = vector.load %arg8[%c0_15, %c0_16, %c0_17, %c0_18] : memref<1x4x16x16xf32, #tpu.memory_space<vmem>>, vector<1x4x16x16xf32>
    %33 = vector.extract_strided_slice %31 {offsets = [0, 0, 0], sizes = [4, 16, 8], strides = [1, 1, 1]} : vector<4x16x96xf32> to vector<4x16x8xf32>
    %34 = vector.extract_strided_slice %31 {offsets = [0, 0, 32], sizes = [4, 16, 8], strides = [1, 1, 1]} : vector<4x16x96xf32> to vector<4x16x8xf32>
    %35 = vector.extract_strided_slice %31 {offsets = [0, 0, 64], sizes = [4, 16, 8], strides = [1, 1, 1]} : vector<4x16x96xf32> to vector<4x16x8xf32>
    "tpu.trace_start"() <{level = 10 : i32, message = "wqd,wkd->wqk"}> : () -> ()
    %cst_19 = arith.constant dense<0.000000e+00> : vector<4x16x16xf32>
    %36 = tpu.matmul %33, %34, %cst_19 {dimension_numbers = #tpu.dot_dimension_numbers<[2], [2], [1], [1], [0, 0, 0, 1, 1, 1], [0], [0]>} : vector<4x16x8xf32>, vector<4x16x8xf32>, vector<4x16x16xf32> -> vector<4x16x16xf32>
    "tpu.trace_stop"() : () -> ()
    %37 = vector.extract_strided_slice %32 {offsets = [0, 0, 0, 0], sizes = [1, 1, 16, 16], strides = [1, 1, 1, 1]} : vector<1x4x16x16xf32> to vector<1x1x16x16xf32>
    %38 = vector.shape_cast %37 : vector<1x1x16x16xf32> to vector<1x16x16xf32>
    %39 = vector.broadcast %38 : vector<1x16x16xf32> to vector<4x16x16xf32>
    %40 = arith.addf %36, %39 : vector<4x16x16xf32>
    %cst_20 = arith.constant dense<0xFF800000> : vector<4x16xf32>
    %41 = vector.multi_reduction <maximumf>, %40, %cst_20 [2] : vector<4x16x16xf32> to vector<4x16xf32>
    %42 = vector.shape_cast %41 : vector<4x16xf32> to vector<4x16x1xf32>
    %43 = vector.broadcast %42 : vector<4x16x1xf32> to vector<4x16x16xf32>
    %44 = arith.subf %40, %43 : vector<4x16x16xf32>
    %45 = math.exp %44 : vector<4x16x16xf32>
    %cst_21 = arith.constant dense<0.000000e+00> : vector<4x16xf32>
    %46 = vector.multi_reduction <add>, %45, %cst_21 [2] : vector<4x16x16xf32> to vector<4x16xf32>
    %47 = vector.shape_cast %46 : vector<4x16xf32> to vector<4x16x1xf32>
    "tpu.trace_start"() <{level = 10 : i32, message = "wqk,wkd->wqd"}> : () -> ()
    %cst_22 = arith.constant dense<0.000000e+00> : vector<4x16x8xf32>
    %48 = tpu.matmul %45, %35, %cst_22 {dimension_numbers = #tpu.dot_dimension_numbers<[2], [1], [1], [2], [0, 0, 0, 1, 1, 2], [0], [0]>} : vector<4x16x16xf32>, vector<4x16x8xf32>, vector<4x16x8xf32> -> vector<4x16x8xf32>
    "tpu.trace_stop"() : () -> ()
    %49 = tpu.reciprocal %47 {approx = true} : vector<4x16x1xf32> -> vector<4x16x1xf32>
    %50 = vector.broadcast %49 : vector<4x16x1xf32> to vector<4x16x8xf32>
    %51 = arith.mulf %48, %50 : vector<4x16x8xf32>
    %52 = vector.extract_strided_slice %31 {offsets = [0, 0, 8], sizes = [4, 16, 8], strides = [1, 1, 1]} : vector<4x16x96xf32> to vector<4x16x8xf32>
    %53 = vector.extract_strided_slice %31 {offsets = [0, 0, 40], sizes = [4, 16, 8], strides = [1, 1, 1]} : vector<4x16x96xf32> to vector<4x16x8xf32>
    %54 = vector.extract_strided_slice %31 {offsets = [0, 0, 72], sizes = [4, 16, 8], strides = [1, 1, 1]} : vector<4x16x96xf32> to vector<4x16x8xf32>
    "tpu.trace_start"() <{level = 10 : i32, message = "wqd,wkd->wqk"}> : () -> ()
    %cst_23 = arith.constant dense<0.000000e+00> : vector<4x16x16xf32>
    %55 = tpu.matmul %52, %53, %cst_23 {dimension_numbers = #tpu.dot_dimension_numbers<[2], [2], [1], [1], [0, 0, 0, 1, 1, 1], [0], [0]>} : vector<4x16x8xf32>, vector<4x16x8xf32>, vector<4x16x16xf32> -> vector<4x16x16xf32>
    "tpu.trace_stop"() : () -> ()
    %56 = vector.extract_strided_slice %32 {offsets = [0, 1, 0, 0], sizes = [1, 1, 16, 16], strides = [1, 1, 1, 1]} : vector<1x4x16x16xf32> to vector<1x1x16x16xf32>
    %57 = vector.shape_cast %56 : vector<1x1x16x16xf32> to vector<1x16x16xf32>
    %58 = vector.broadcast %57 : vector<1x16x16xf32> to vector<4x16x16xf32>
    %59 = arith.addf %55, %58 : vector<4x16x16xf32>
    %cst_24 = arith.constant dense<0xFF800000> : vector<4x16xf32>
    %60 = vector.multi_reduction <maximumf>, %59, %cst_24 [2] : vector<4x16x16xf32> to vector<4x16xf32>
    %61 = vector.shape_cast %60 : vector<4x16xf32> to vector<4x16x1xf32>
    %62 = vector.broadcast %61 : vector<4x16x1xf32> to vector<4x16x16xf32>
    %63 = arith.subf %59, %62 : vector<4x16x16xf32>
    %64 = math.exp %63 : vector<4x16x16xf32>
    %cst_25 = arith.constant dense<0.000000e+00> : vector<4x16xf32>
    %65 = vector.multi_reduction <add>, %64, %cst_25 [2] : vector<4x16x16xf32> to vector<4x16xf32>
    %66 = vector.shape_cast %65 : vector<4x16xf32> to vector<4x16x1xf32>
    "tpu.trace_start"() <{level = 10 : i32, message = "wqk,wkd->wqd"}> : () -> ()
    %cst_26 = arith.constant dense<0.000000e+00> : vector<4x16x8xf32>
    %67 = tpu.matmul %64, %54, %cst_26 {dimension_numbers = #tpu.dot_dimension_numbers<[2], [1], [1], [2], [0, 0, 0, 1, 1, 2], [0], [0]>} : vector<4x16x16xf32>, vector<4x16x8xf32>, vector<4x16x8xf32> -> vector<4x16x8xf32>
    "tpu.trace_stop"() : () -> ()
    %68 = tpu.reciprocal %66 {approx = true} : vector<4x16x1xf32> -> vector<4x16x1xf32>
    %69 = vector.broadcast %68 : vector<4x16x1xf32> to vector<4x16x8xf32>
    %70 = arith.mulf %67, %69 : vector<4x16x8xf32>
    %71 = vector.extract_strided_slice %31 {offsets = [0, 0, 16], sizes = [4, 16, 8], strides = [1, 1, 1]} : vector<4x16x96xf32> to vector<4x16x8xf32>
    %72 = vector.extract_strided_slice %31 {offsets = [0, 0, 48], sizes = [4, 16, 8], strides = [1, 1, 1]} : vector<4x16x96xf32> to vector<4x16x8xf32>
    %73 = vector.extract_strided_slice %31 {offsets = [0, 0, 80], sizes = [4, 16, 8], strides = [1, 1, 1]} : vector<4x16x96xf32> to vector<4x16x8xf32>
    "tpu.trace_start"() <{level = 10 : i32, message = "wqd,wkd->wqk"}> : () -> ()
    %cst_27 = arith.constant dense<0.000000e+00> : vector<4x16x16xf32>
    %74 = tpu.matmul %71, %72, %cst_27 {dimension_numbers = #tpu.dot_dimension_numbers<[2], [2], [1], [1], [0, 0, 0, 1, 1, 1], [0], [0]>} : vector<4x16x8xf32>, vector<4x16x8xf32>, vector<4x16x16xf32> -> vector<4x16x16xf32>
    "tpu.trace_stop"() : () -> ()
    %75 = vector.extract_strided_slice %32 {offsets = [0, 2, 0, 0], sizes = [1, 1, 16, 16], strides = [1, 1, 1, 1]} : vector<1x4x16x16xf32> to vector<1x1x16x16xf32>
    %76 = vector.shape_cast %75 : vector<1x1x16x16xf32> to vector<1x16x16xf32>
    %77 = vector.broadcast %76 : vector<1x16x16xf32> to vector<4x16x16xf32>
    %78 = arith.addf %74, %77 : vector<4x16x16xf32>
    %cst_28 = arith.constant dense<0xFF800000> : vector<4x16xf32>
    %79 = vector.multi_reduction <maximumf>, %78, %cst_28 [2] : vector<4x16x16xf32> to vector<4x16xf32>
    %80 = vector.shape_cast %79 : vector<4x16xf32> to vector<4x16x1xf32>
    %81 = vector.broadcast %80 : vector<4x16x1xf32> to vector<4x16x16xf32>
    %82 = arith.subf %78, %81 : vector<4x16x16xf32>
    %83 = math.exp %82 : vector<4x16x16xf32>
    %cst_29 = arith.constant dense<0.000000e+00> : vector<4x16xf32>
    %84 = vector.multi_reduction <add>, %83, %cst_29 [2] : vector<4x16x16xf32> to vector<4x16xf32>
    %85 = vector.shape_cast %84 : vector<4x16xf32> to vector<4x16x1xf32>
    "tpu.trace_start"() <{level = 10 : i32, message = "wqk,wkd->wqd"}> : () -> ()
    %cst_30 = arith.constant dense<0.000000e+00> : vector<4x16x8xf32>
    %86 = tpu.matmul %83, %73, %cst_30 {dimension_numbers = #tpu.dot_dimension_numbers<[2], [1], [1], [2], [0, 0, 0, 1, 1, 2], [0], [0]>} : vector<4x16x16xf32>, vector<4x16x8xf32>, vector<4x16x8xf32> -> vector<4x16x8xf32>
    "tpu.trace_stop"() : () -> ()
    %87 = tpu.reciprocal %85 {approx = true} : vector<4x16x1xf32> -> vector<4x16x1xf32>
    %88 = vector.broadcast %87 : vector<4x16x1xf32> to vector<4x16x8xf32>
    %89 = arith.mulf %86, %88 : vector<4x16x8xf32>
    %90 = vector.extract_strided_slice %31 {offsets = [0, 0, 24], sizes = [4, 16, 8], strides = [1, 1, 1]} : vector<4x16x96xf32> to vector<4x16x8xf32>
    %91 = vector.extract_strided_slice %31 {offsets = [0, 0, 56], sizes = [4, 16, 8], strides = [1, 1, 1]} : vector<4x16x96xf32> to vector<4x16x8xf32>
    %92 = vector.extract_strided_slice %31 {offsets = [0, 0, 88], sizes = [4, 16, 8], strides = [1, 1, 1]} : vector<4x16x96xf32> to vector<4x16x8xf32>
    "tpu.trace_start"() <{level = 10 : i32, message = "wqd,wkd->wqk"}> : () -> ()
    %cst_31 = arith.constant dense<0.000000e+00> : vector<4x16x16xf32>
    %93 = tpu.matmul %90, %91, %cst_31 {dimension_numbers = #tpu.dot_dimension_numbers<[2], [2], [1], [1], [0, 0, 0, 1, 1, 1], [0], [0]>} : vector<4x16x8xf32>, vector<4x16x8xf32>, vector<4x16x16xf32> -> vector<4x16x16xf32>
    "tpu.trace_stop"() : () -> ()
    %94 = vector.extract_strided_slice %32 {offsets = [0, 3, 0, 0], sizes = [1, 1, 16, 16], strides = [1, 1, 1, 1]} : vector<1x4x16x16xf32> to vector<1x1x16x16xf32>
    %95 = vector.shape_cast %94 : vector<1x1x16x16xf32> to vector<1x16x16xf32>
    %96 = vector.broadcast %95 : vector<1x16x16xf32> to vector<4x16x16xf32>
    %97 = arith.addf %93, %96 : vector<4x16x16xf32>
    %cst_32 = arith.constant dense<0xFF800000> : vector<4x16xf32>
    %98 = vector.multi_reduction <maximumf>, %97, %cst_32 [2] : vector<4x16x16xf32> to vector<4x16xf32>
    %99 = vector.shape_cast %98 : vector<4x16xf32> to vector<4x16x1xf32>
    %100 = vector.broadcast %99 : vector<4x16x1xf32> to vector<4x16x16xf32>
    %101 = arith.subf %97, %100 : vector<4x16x16xf32>
    %102 = math.exp %101 : vector<4x16x16xf32>
    %cst_33 = arith.constant dense<0.000000e+00> : vector<4x16xf32>
    %103 = vector.multi_reduction <add>, %102, %cst_33 [2] : vector<4x16x16xf32> to vector<4x16xf32>
    %104 = vector.shape_cast %103 : vector<4x16xf32> to vector<4x16x1xf32>
    "tpu.trace_start"() <{level = 10 : i32, message = "wqk,wkd->wqd"}> : () -> ()
    %cst_34 = arith.constant dense<0.000000e+00> : vector<4x16x8xf32>
    %105 = tpu.matmul %102, %92, %cst_34 {dimension_numbers = #tpu.dot_dimension_numbers<[2], [1], [1], [2], [0, 0, 0, 1, 1, 2], [0], [0]>} : vector<4x16x16xf32>, vector<4x16x8xf32>, vector<4x16x8xf32> -> vector<4x16x8xf32>
    "tpu.trace_stop"() : () -> ()
    %106 = tpu.reciprocal %104 {approx = true} : vector<4x16x1xf32> -> vector<4x16x1xf32>
    %107 = vector.broadcast %106 : vector<4x16x1xf32> to vector<4x16x8xf32>
    %108 = arith.mulf %105, %107 : vector<4x16x8xf32>
    %109 = tpu.concatenate %51, %70, %89, %108 in 2 : vector<4x16x8xf32>, vector<4x16x8xf32>, vector<4x16x8xf32>, vector<4x16x8xf32> -> vector<4x16x32xf32>
    %110 = vector.shape_cast %109 : vector<4x16x32xf32> to vector<64x32xf32>
    %c0_35 = arith.constant 0 : index
    %c0_36 = arith.constant 0 : index
    %111 = vector.load %arg6[%c0_35, %c0_36] : memref<32x32xf32, #tpu.memory_space<vmem>>, vector<32x32xf32>
    %cst_37 = arith.constant dense<0.000000e+00> : vector<64x32xf32>
    %112 = tpu.matmul %110, %111, %cst_37 {dimension_numbers = #tpu.dot_dimension_numbers<[1], [0], [0], [1], [0, 0, 1, 1], [], []>} : vector<64x32xf32>, vector<32x32xf32>, vector<64x32xf32> -> vector<64x32xf32>
    %c0_38 = arith.constant 0 : index
    %c0_39 = arith.constant 0 : index
    %113 = vector.load %arg7[%c0_38, %c0_39] : memref<1x32xf32, #tpu.memory_space<vmem>>, vector<1x32xf32>
    %114 = vector.broadcast %113 : vector<1x32xf32> to vector<64x32xf32>
    %115 = arith.addf %112, %114 : vector<64x32xf32>
    %116 = vector.shape_cast %0 : vector<4x16x32xf32> to vector<64x32xf32>
    %117 = arith.addf %115, %116 : vector<64x32xf32>
    %118 = vector.shape_cast %117 : vector<64x32xf32> to vector<4x16x32xf32>
    %c0_40 = arith.constant 0 : index
    %c0_41 = arith.constant 0 : index
    %c0_42 = arith.constant 0 : index
    %119 = vector.load %arg9[%c0_40, %c0_41, %c0_42] : memref<4x16x32xf32, #tpu.memory_space<vmem>>, vector<4x16x32xf32>
    tpu.vector_store %arg9[%c0_40, %c0_41, %c0_42], %118 {strides = array<i32>} : memref<4x16x32xf32, #tpu.memory_space<vmem>>, vector<4x16x32xf32>,
    return
  }
  func.func @transform_0(%arg0: i32) -> (i32, i32, i32) {
    %c0_i32 = arith.constant 0 : i32
    %c0_i32_0 = arith.constant 0 : i32
    %c0_i32_1 = arith.constant 0 : i32
    return %arg0, %c0_i32, %c0_i32_0 : i32, i32, i32
  }
  func.func @transform_1(%arg0: i32) -> (i32, i32) {
    %c0_i32 = arith.constant 0 : i32
    %c0_i32_0 = arith.constant 0 : i32
    %c0_i32_1 = arith.constant 0 : i32
    return %c0_i32, %c0_i32_0 : i32, i32
  }
  func.func @transform_2(%arg0: i32) -> (i32, i32) {
    %c0_i32 = arith.constant 0 : i32
    %c0_i32_0 = arith.constant 0 : i32
    %c0_i32_1 = arith.constant 0 : i32
    return %c0_i32, %c0_i32_0 : i32, i32
  }
  func.func @transform_3(%arg0: i32) -> (i32, i32) {
    %c0_i32 = arith.constant 0 : i32
    %c0_i32_0 = arith.constant 0 : i32
    %c0_i32_1 = arith.constant 0 : i32
    return %c0_i32, %c0_i32_0 : i32, i32
  }
  func.func @transform_4(%arg0: i32) -> (i32, i32) {
    %c0_i32 = arith.constant 0 : i32
    %c0_i32_0 = arith.constant 0 : i32
    %c0_i32_1 = arith.constant 0 : i32
    return %c0_i32, %c0_i32_0 : i32, i32
  }
  func.func @transform_5(%arg0: i32) -> (i32, i32) {
    %c0_i32 = arith.constant 0 : i32
    %c0_i32_0 = arith.constant 0 : i32
    %c0_i32_1 = arith.constant 0 : i32
    return %c0_i32, %c0_i32_0 : i32, i32
  }
  func.func @transform_6(%arg0: i32) -> (i32, i32) {
    %c0_i32 = arith.constant 0 : i32
    %c0_i32_0 = arith.constant 0 : i32
    %c0_i32_1 = arith.constant 0 : i32
    return %c0_i32, %c0_i32_0 : i32, i32
  }
  func.func @transform_7(%arg0: i32) -> (i32, i32, i32, i32) {
    %c1_i32 = arith.constant 1 : i32
    %c0_i32 = arith.constant 0 : i32
    %0 = arith.cmpi eq, %c1_i32, %c0_i32 : i32
    %c1_i32_0 = arith.constant 1 : i32
    %1 = arith.select %0, %c1_i32_0, %c1_i32 : i32
    %2 = arith.remsi %arg0, %1 : i32
    %c0_i32_1 = arith.constant 0 : i32
    %3 = arith.cmpi ne, %2, %c0_i32_1 : i32
    %c0_i32_2 = arith.constant 0 : i32
    %4 = arith.cmpi slt, %2, %c0_i32_2 : i32
    %c0_i32_3 = arith.constant 0 : i32
    %5 = arith.cmpi slt, %1, %c0_i32_3 : i32
    %6 = arith.xori %4, %5 : i1
    %7 = arith.andi %6, %3 : i1
    %8 = arith.addi %2, %1 : i32
    %9 = arith.select %7, %8, %2 : i32
    %c0_i32_4 = arith.constant 0 : i32
    %c0_i32_5 = arith.constant 0 : i32
    %c0_i32_6 = arith.constant 0 : i32
    %c0_i32_7 = arith.constant 0 : i32
    return %9, %c0_i32_4, %c0_i32_5, %c0_i32_6 : i32, i32, i32, i32
  }
  func.func @transform_8(%arg0: i32) -> (i32, i32, i32) {
    %c0_i32 = arith.constant 0 : i32
    %c0_i32_0 = arith.constant 0 : i32
    %c0_i32_1 = arith.constant 0 : i32
    return %arg0, %c0_i32, %c0_i32_0 : i32, i32, i32
  }
}

</mosaic_0001>

<bundles_post_ra>
// kernel: tpu_custom_call.1
= control target key start
LH: loop header
LB: loop body
LE: loop exit
PB: predicated region body
PF: predicated region fallthrough
CT: control target
= control target key end

     0   :  { %s6404_s0 = inlined_call_operand.hbm [shape: f32[8,16,32], index: 0, kind: input, shape index: {}]   ;;  %s6405_s1 = inlined_call_operand.vmem [shape: f32[1,32], index: 1, kind: input, shape index: {}]   ;;  %s6406_s2 = inlined_call_operand.vmem [shape: f32[1,32], index: 2, kind: input, shape index: {}]   ;;  %s6407_s3 = inlined_call_operand.hbm [shape: f32[32,96], index: 3, kind: input, shape index: {}]   ;;  %s6408_s4 = inlined_call_operand.vmem [shape: f32[1,96], index: 4, kind: input, shape index: {}]   ;;  %s6409_s5 = inlined_call_operand.hbm [shape: f32[32,32], index: 5, kind: input, shape index: {}]   ;;  %s6410_s6 = inlined_call_operand.vmem [shape: f32[1,32], index: 6, kind: input, shape index: {}]   ;;  %s6411_s7 = inlined_call_operand.hbm [shape: f32[1,4,16,16], index: 7, kind: input, shape index: {}]   ;;  %s6412_s8 = inlined_call_operand.hbm [shape: f32[8,16,32], index: 8, kind: output, shape index: {}]  }
   0x1   :  { %6419 = sst [smem:[#allocation20_spill]] %s6407_s3 }
   0x2   :  { %6420 = sst [smem:[#allocation21_spill]] %s6409_s5 }
   0x3   :  { %13 = vsyncpa [#allocation3], 0 }
   0x4   :  { %15 = vsyncpa [#allocation3 + $0x1], 0 }
   0x5   :  { %16 = vsyncpa [#allocation6], 0 }
   0x6   :  { %17 = vsyncpa [#allocation9], 0 }
   0x7   :  { %18 = vsyncpa [#allocation4], 0 }
   0x8   :  { %20 = vsyncpa [#allocation4 + $0x1], 0  ;;  %s5310_s27 = smov 0   ;;  %s5312_s28 = smov 0  }
   0x9   :  { %s5314_s29 = smov 0   ;;  %s5316_s30 = smov 0  }
   0xa LB: > { %s5331_s9 = sadd.s32 4294967295, %s5241_s30   ;;  %s4251_s10 = sadd.s32 4294967294, %s5241_s30   ;;  %s5241_s30 = sphi %s5316_s30, %s6453_s30   ;;  %s5237_s29 = sphi %s5314_s29, %s6452_s29   ;;  %s5233_s28 = sphi %s5312_s28, %s6451_s28   ;;  %s5229_s27 = sphi %s5310_s27, %s6450_s27  }
   0xb   : > { %p46_p0 = scmp.ne.s32.totalorder %s5233_s28, %s5229_s27  ;;  %p6413_p1 = scmp.eq.s32.totalorder %s5331_s9, 0 }
   0xc   : > { %p217_p2 = scmp.eq.s32.totalorder %s5331_s9, 1  ;;  %p223_p3 = scmp.eq.s32.totalorder %s4251_s10, 1 }
   0xd   : > { %p5340_p4 = por %p6413_p1, %p46_p0  ;;  %p4252_p5 = scmp.ge.s32.totalorder %s5241_s30, 1 }
   0xe   : > { %p5345_p6 = por %p223_p3, %p46_p0  ;;  %p230_p7 = scmp.lt.s32.totalorder %s5241_s30, 3 }
   0xf   : > { %s6421_s11 = scalar_select %p5340_p4, 1, 0 }
  0x10   : > { %s6422_s12 = scalar_select %p5345_p6, 1, 0 }
  0x11   : > { %p5350_p8 = pnand %p4252_p5, %p230_p7  ;;  %s5243_s14 = smov [#allocation5]  }
  0x12   : > { %s248_s15 = sshll.u32 %s5243_s14, 4  ;;  %s5244_s17 = smov [#allocation7]   ;;  %s249_s15 = int_to_ptr.vmem [resolvable:$true] %s248_s15 }
  0x13   : > { %s6423_s13 = scalar_select %p5350_p8, 1, 0 }
  0x14   : > { %p4833_p9 = pneg %p5350_p8  ;;  %s264_s18 = sshll.u32 %s5244_s17, 4  ;;  %s265_s18 = int_to_ptr.vmem [resolvable:$true] %s264_s18 }
  0x15   : > { %s5245_s19 = smov [#allocation8]   ;;  %s5074_s21 = scalar_lea.vmem %s249_s15, 512 }
  0x16   : > { %p5359_p11 = pnand %p4833_p9, %p6413_p1  ;;  %s280_s20 = sshll.u32 %s5245_s19, 4  ;;  %s281_s20 = int_to_ptr.vmem [resolvable:$true] %s280_s20 }
  0x17   : > { %p5075_p13 = scmp.ne.s32.totalorder %s249_s15, %s5074_s21  ;;  %p5082_p5 = scmp.lt.s32.totalorder %s249_s15, %s249_s15 }
  0x18   : > { %p5065_p12 = pneg %p5359_p11  ;;  %p5083_p7 = scmp.lt.s32.totalorder %s5074_s21, %s5074_s21 }
  0x1a   : > { %p5077_p0 = pnand %p5075_p13, %p5065_p12  ;;  %p5084_p9 = por %p5083_p7, %p5082_p5 }
  0x1c   : > { %p5078_p3 = pneg %p5077_p0 }
  0x1e   : > { %p5085_p10 = pnand %p5084_p9, %p5078_p3 }
  0x20   : > { %5088 = shalt.err (!%p5085_p10)
}
  0x21   : > { %s6414_s22 = smov 128   ;;  %s6415_s23 = smov 8  }
  0x22   : > { %s6425_s3 = sld [smem:[#allocation20_spill]]  ;;  %s5100_s26 = scalar_lea.vmem %s265_s18, 512 }
  0x23   : > { %p5101_p13 = scmp.ne.s32.totalorder %s265_s18, %s5100_s26  ;;  %p5108_p3 = scmp.lt.s32.totalorder %s265_s18, %s265_s18 }
  0x24   : > { %p5109_p10 = scmp.lt.s32.totalorder %s5100_s26, %s5100_s26 }
  0x25   : > { %p5103_p0 = pnand %p5101_p13, %p5065_p12 }
  0x26   : > { %p5110_p7 = por %p5109_p10, %p5108_p3 }
  0x27   : > { %p5104_p5 = pneg %p5103_p0 }
  0x28   : > { %4836 = dma.hbm_to_vmem [thread:$0]  (!%p5359_p11), %s6425_s3, 512, %s249_s15, [#allocation6], %s6414_s22, %s6414_s22, %s6415_s23  }
  0x29   : > { %p5111_p9 = pnand %p5110_p7, %p5104_p5 }
  0x2b   : > { %5114 = shalt.err (!%p5111_p9)
}
  0x2c   : > { %s6426_s5 = sld [smem:[#allocation21_spill]]  ;;  %s5126_s15 = scalar_lea.vmem %s281_s20, 1024 }
  0x2d   : > { %p5127_p1 = scmp.ne.s32.totalorder %s281_s20, %s5126_s15  ;;  %p5134_p3 = scmp.lt.s32.totalorder %s281_s20, %s281_s20 }
  0x2e   : > { %p5135_p5 = scmp.lt.s32.totalorder %s5126_s15, %s5126_s15 }
  0x2f   : > { %p5129_p13 = pnand %p5127_p1, %p5065_p12 }
  0x30   : > { %p5136_p10 = por %p5135_p5, %p5134_p3 }
  0x31   : > { %p5130_p0 = pneg %p5129_p13 }
  0x32   : > { %4839 = dma.hbm_to_vmem [thread:$0]  (!%p5359_p11), %s6426_s5, 512, %s265_s18, [#allocation6], %s6414_s22, %s6414_s22, %s6415_s23  }
  0x33   : > { %p5137_p7 = pnand %p5136_p10, %p5130_p0 }
  0x35   : > { %5140 = shalt.err (!%p5137_p7)
}
  0x36   : > { %4842 = dma.hbm_to_vmem [thread:$0]  (!%p5359_p11), %s6411_s7, 1024, %s281_s20, [#allocation9], %s6414_s22, %s6414_s22, %s6415_s23  }
  0x37   : > { %s5399_s18 = sadd.s32 1, %s5241_s30   ;;  %s33_s21 = sadd.s32 1, %s5237_s29 }
  0x38   : > { %s30_s16 = ssub.s32 %s5241_s30, %s5399_s18  ;;  %p40_p12 = scmp.ne.s32.totalorder %s5237_s29, %s5233_s28 }
  0x39   : > { %p31_p1 = scmp.eq.s32.totalorder %s30_s16, 0  ;;  %p41_p9 = scmp.eq.s32.totalorder %s5241_s30, 0 }
  0x3a   : > { %p4854_p13 = scmp.lt.s32.totalorder %s5241_s30, 2  ;;  %p5413_p3 = por %p217_p2, %p40_p12 }
  0x3b   : > { %s5409_s24 = scalar_select %p31_p1, %s5237_s29, %s33_s21  }
  0x3c   : > { %p42_p0 = por %p41_p9, %p40_p12  ;;  %s294_s26 = sand.u32 1, %s5237_s29  }
  0x3d   : > { %s6427_s25 = scalar_select %p5413_p3, 1, 0 }
  0x3e   : > { %s4390_s10 = sshll.u32 %s5241_s30, 10  ;;  %s4257_s20 = sshll.u32 %s294_s26, 6 }
  0x3f   : > { %s5422_s17 = scalar_lea.hbm %s6404_s0, %s4390_s10  ;;  %s298_s19 = scalar_lea.vmem [#allocation2], %s4257_s20 }
  0x40   : > { %s306_s16 = sshll.u32 %s298_s19, 4  ;;  %p5424_p11 = pnand %p4854_p13, %p42_p0  ;;  %s5428_s16 = int_to_ptr.vmem [resolvable:$true] %s306_s16 }
  0x41   : > { %s5430_s22 = scalar_lea.sflag [#allocation3], %s294_s26  ;;  %s5141_s23 = scalar_lea.hbm %s5422_s17, 1024 }
  0x42   : > { %p5142_p2 = scmp.ne.s32.totalorder %s5422_s17, %s5141_s23  ;;  %p5143_p5 = pneg %p5424_p11 }
  0x43   : > { %s5146_s20 = scalar_lea.hbm %s6404_s0, 2048  ;;  %p5147_p1 = scmp.lt.s32.totalorder %s5422_s17, %s6404_s0 }
  0x44   : > { %p5144_p10 = pnand %p5143_p5, %p5142_p2  ;;  %p5148_p12 = scmp.lt.s32.totalorder %s5146_s20, %s5141_s23 }
  0x46   : > { %p5145_p7 = pneg %p5144_p10  ;;  %p5149_p9 = por %p5148_p12, %p5147_p1 }
  0x48   : > { %p5150_p13 = pnand %p5149_p9, %p5145_p7 }
  0x4a   : > { %5153 = shalt.err (!%p5150_p13)
}
  0x4b   : > { %s5154_s26 = scalar_lea.vmem %s5428_s16, 1024  ;;  %s5248_s3 = smov [#allocation2]  }
  0x4c   : > { %p5155_p0 = scmp.ne.s32.totalorder %s5428_s16, %s5154_s26  ;;  %s5159_s5 = sshll.u32 %s5248_s3, 4  ;;  %s5160_s5 = int_to_ptr.vmem [resolvable:$false] %s5159_s5 }
  0x4d   : > { %s5161_s10 = scalar_lea.vmem %s5160_s5, 2048  ;;  %p5162_p10 = scmp.lt.s32.totalorder %s5428_s16, %s5160_s5 }
  0x4e   : > { %p5157_p6 = pnand %p5155_p0, %p5143_p5  ;;  %p5163_p3 = scmp.lt.s32.totalorder %s5161_s10, %s5154_s26 }
  0x50   : > { %p5158_p2 = pneg %p5157_p6  ;;  %p5164_p4 = por %p5163_p3, %p5162_p10 }
  0x52   : > { %p5165_p8 = pnand %p5164_p4, %p5158_p2 }
  0x54   : > { %5168 = shalt.err (!%p5165_p8)
}
  0x55   : > { %s6429_s23 = smov 8   ;;  %s6430_s14 = smov 128  }
  0x56   : > { %4846 = dma.hbm_to_vmem [thread:$0]  (!%p5424_p11), %s5422_s17, 1024, %s5428_s16, %s5430_s22, %s6430_s14, %s6430_s14, %s6429_s23  }
  0x57   : > { %p6431_p6 = scmp.ne.s32.totalorder %s6423_s13, 0 }
  0x59   : > { %318 = sbr.rel (%p6431_p6) target bundleno = 2758 (0xac6), region = 52 }
  0x5e   : > { %s5457_s3 = sand.u32 1, %s5233_s28   ;;  %p6432_p4 = scmp.ne.s32.totalorder %s6421_s11, 0 }
  0x5f   : > { %s4262_s5 = sshll.u32 %s5457_s3, 6  ;;  %s321_s20 = scalar_lea.sflag [#allocation3], %s5457_s3 }
  0x60   : > { %s5463_s21 = scalar_lea.vmem [#allocation2], %s4262_s5 }
  0x61   : > { %5212 = dma.done.wait (%p6432_p4), %s321_s20, 1024  }
  0x62   : > { %5214 = vsyncadd (%p6432_p4), %s321_s20, 4294966272  ;;  %p6433_p8 = scmp.eq.s32.totalorder %s5331_s9, 0 }
  0x64   : > { %5216 = dma.done.wait (%p6433_p8), [#allocation6], 1024   ;;  %p6434_p3 = pmov %p6433_p8 }
  0x66   : > { %5218 = vsyncadd (%p6434_p3), [#allocation6], 4294966272  ;;  %p6435_p11 = pmov %p6434_p3 }
  0x67   : > { %p6436_p5 = pmov %p6434_p3 }
  0x68   : > { %5220 = dma.done.wait (%p6435_p11), [#allocation9], 1024  }
  0x69   : > { %5222 = vsyncadd (%p6436_p5), [#allocation9], 4294966272  ;;  %vm379_vm0 = vcmask 261120   ;;  %v371_v0 = vld [vmem:[%s5463_s21] sm:$0xff]  ;;  %v373_v1 = vld [vmem:[%s5463_s21 + $0x10] sm:$0xff]  ;;  %vm669_vm1 = vcmask 64512  }
  0x6a   : > { %v372_v2 = vld [vmem:[%s5463_s21 + $0x8] sm:$0xff]  ;;  %v380_v3 = vsel %vm379_vm0, %v371_v0, 0.0  ;;  %v386_v4 = vsel %vm379_vm0, %v373_v1, 0.0  ;;  %v374_v5 = vld [vmem:[%s5463_s21 + $0x18] sm:$0xff]  ;;  %v375_v8 = vld [vmem:[%s5463_s21 + $0x20] sm:$0xff]  ;;  %s5249_s19 = smov 96  }
  0x6b   : > { %381 = vadd.xlane.f32.xlu0 %v380_v3  ;;  %387 = vadd.xlane.f32.xlu1 %v386_v4  ;;  %v383_v6 = vsel %vm379_vm0, %v372_v2, 0.0  ;;  %v389_v7 = vsel %vm379_vm0, %v374_v5, 0.0  ;;  %v376_v9 = vld [vmem:[%s5463_s21 + $0x28] sm:$0xff]  ;;  %v392_v10 = vsel %vm379_vm0, %v375_v8, 0.0  ;;  %v377_v12 = vld [vmem:[%s5463_s21 + $0x30] sm:$0xff]  ;;  %v378_v13 = vld [vmem:[%s5463_s21 + $0x38] sm:$0xff] }
  0x6c   : > { %v395_v11 = vsel %vm379_vm0, %v376_v9, 0.0  ;;  %v398_v14 = vsel %vm379_vm0, %v377_v12, 0.0  ;;  %v401_v15 = vsel %vm379_vm0, %v378_v13, 0.0  ;;  %v518_v56 = vld [vmem:[#allocation5 + $0x18] sm:$0xff]  ;;  %v517_v57 = vld [vmem:[#allocation5 + $0x10] sm:$0xff]  ;;  %v516_v58 = vld [vmem:[#allocation5 + $0x8] sm:$0xff] }
  0x6d   : > { %4545 = vmatprep.subr.mxu0 %v518_v56  ;;  %4809 = vmatprep.subr.mxu1 %v518_v56  ;;  %v515_v59 = vld [vmem:[#allocation5] sm:$0xff]  ;;  %s5250_s26 = smov 64   ;;  %s5251_s10 = smov 88   ;;  %vm1020_vm2 = vcmask 130048   ;;  %vm3969_vm3 = vcmask 195584  }
  0x6e   : > { %4546 = vmatpush3.msra.mxu0 %v518_v56  ;;  %4813 = vmatpush3.msra.mxu1 %v518_v56  ;;  %s5252_s23 = smov 120   ;;  %s5253_s14 = smov 56  }
  0x6f   : > { %384 = vadd.xlane.f32.xlu0 %v383_v6  ;;  %390 = vadd.xlane.f32.xlu1 %v389_v7  ;;  %s5254_s20 = smov 80   ;;  %s5255_s11 = smov 112  }
  0x70   : > { %4547 = vmatprep.subr.mxu0 %v517_v57  ;;  %4810 = vmatprep.subr.mxu1 %v517_v57  ;;  %s5256_s13 = smov 48   ;;  %s5257_s22 = smov 72  }
  0x71   : > { %4548 = vmatpush3.msra.mxu0 %v517_v57  ;;  %4814 = vmatpush3.msra.mxu1 %v517_v57  ;;  %s5258_s17 = smov 104   ;;  %s5259_s16 = smov 40  }
  0x72   : > { %4549 = vmatprep.subr.mxu0 %v516_v58  ;;  %4811 = vmatprep.subr.mxu1 %v516_v58  ;;  %s5260_s15 = smov 8   ;;  %p6447_p1 = scmp.ne.s32.totalorder %s6427_s25, 0 }
  0x73   : > { %393 = vadd.xlane.f32.xlu0 %v392_v10  ;;  %396 = vadd.xlane.f32.xlu1 %v395_v11 }
  0x74   : > { %4550 = vmatpush3.msra.mxu0 %v516_v58  ;;  %4815 = vmatpush3.msra.mxu1 %v516_v58 }
  0x75   : > { %4551 = vmatprep.subr.mxu0 %v515_v59  ;;  %4812 = vmatprep.subr.mxu1 %v515_v59 }
  0x76   : > { %4552 = vmatpush3.msra.mxu0 %v515_v59  ;;  %4816 = vmatpush3.msra.mxu1 %v515_v59 }
  0x77   : > { %399 = vadd.xlane.f32.xlu0 %v398_v14  ;;  %402 = vadd.xlane.f32.xlu1 %v401_v15 }
  0xf4   : > { %v382_v16 = vpop.xlane.xlu0 %381  ;;  %v388_v17 = vpop.xlane.xlu1 %387 }
  0xf5   : > { %v405_v18 = vmul.f32 0.03125, %v382_v16  ;;  %v407_v19 = vmul.f32 0.03125, %v388_v17 }
  0xf7   : > { %v5493_v20 = vsub.f32 %v371_v0, %v405_v18  ;;  %v5495_v21 = vsub.f32 %v373_v1, %v407_v19 }
  0xf8   : > { %v385_v22 = vpop.xlane.xlu0 %384  ;;  %v391_v23 = vpop.xlane.xlu1 %390 }
  0xf9   : > { %v406_v24 = vmul.f32 0.03125, %v385_v22  ;;  %v408_v25 = vmul.f32 0.03125, %v391_v23  ;;  %v421_v26 = vmul.f32 %v5493_v20, %v5493_v20  ;;  %v423_v27 = vmul.f32 %v5495_v21, %v5495_v21  ;;  %v4267_v22 = vld [vmem:[%s6405_s1] ss:$0 sm:$0xff] }
  0xfb   : > { %v5501_v28 = vsub.f32 %v372_v2, %v406_v24  ;;  %v5503_v29 = vsub.f32 %v374_v5, %v408_v25  ;;  %v429_v30 = vsel %vm379_vm0, %v421_v26, 0.0  ;;  %v435_v33 = vsel %vm379_vm0, %v423_v27, 0.0  ;;  %v4268_v25 = vld [vmem:[%s6406_s2] ss:$0 sm:$0xff] }
  0xfc   : > { %430 = vadd.xlane.f32.xlu0 %v429_v30  ;;  %v394_v31 = vpop.xlane.xlu0 %393  ;;  %v397_v32 = vpop.xlane.xlu1 %396 }
  0xfd   : > { %v409_v34 = vmul.f32 0.03125, %v394_v31  ;;  %v410_v35 = vmul.f32 0.03125, %v397_v32  ;;  %v422_v36 = vmul.f32 %v5501_v28, %v5501_v28  ;;  %v424_v37 = vmul.f32 %v5503_v29, %v5503_v29 }
  0xff   : > { %v5511_v38 = vsub.f32 %v375_v8, %v409_v34  ;;  %v5513_v39 = vsub.f32 %v376_v9, %v410_v35  ;;  %v432_v40 = vsel %vm379_vm0, %v422_v36, 0.0  ;;  %v438_v43 = vsel %vm379_vm0, %v424_v37, 0.0 }
 0x100   : > { %436 = vadd.xlane.f32.xlu0 %v435_v33  ;;  %433 = vadd.xlane.f32.xlu1 %v432_v40  ;;  %v400_v41 = vpop.xlane.xlu0 %399  ;;  %v403_v42 = vpop.xlane.xlu1 %402 }
 0x101   : > { %v411_v44 = vmul.f32 0.03125, %v400_v41  ;;  %v412_v45 = vmul.f32 0.03125, %v403_v42  ;;  %v425_v46 = vmul.f32 %v5511_v38, %v5511_v38  ;;  %v426_v47 = vmul.f32 %v5513_v39, %v5513_v39 }
 0x103   : > { %v5521_v48 = vsub.f32 %v377_v12, %v411_v44  ;;  %v5523_v49 = vsub.f32 %v378_v13, %v412_v45  ;;  %v441_v50 = vsel %vm379_vm0, %v425_v46, 0.0  ;;  %v444_v51 = vsel %vm379_vm0, %v426_v47, 0.0 }
 0x104   : > { %439 = vadd.xlane.f32.xlu1 %v438_v43  ;;  %442 = vadd.xlane.f32.xlu0 %v441_v50 }
 0x105   : > { %v427_v52 = vmul.f32 %v5521_v48, %v5521_v48  ;;  %v428_v53 = vmul.f32 %v5523_v49, %v5523_v49 }
 0x107   : > { %v447_v54 = vsel %vm379_vm0, %v427_v52, 0.0  ;;  %v450_v55 = vsel %vm379_vm0, %v428_v53, 0.0 }
 0x108   : > { %445 = vadd.xlane.f32.xlu1 %v444_v51  ;;  %448 = vadd.xlane.f32.xlu0 %v447_v54 }
 0x10c   : > { %451 = vadd.xlane.f32.xlu1 %v450_v55 }
 0x185   : > { %v431_v60 = vpop.xlane.xlu0 %430 }
 0x186   : > { %v453_v61 = vmul.f32 0.03125, %v431_v60 }
 0x188   : > { %v461_v62 = vadd.f32 1e-05, %v453_v61 }
 0x189   : > { %v434_v63 = vpop.xlane.xlu1 %433  ;;  %v437_v0 = vpop.xlane.xlu0 %436 }
 0x18a   : > { %4911 = vrsqrt.f32 %v461_v62  ;;  %v454_v1 = vmul.f32 0.03125, %v434_v63  ;;  %v455_v2 = vmul.f32 0.03125, %v437_v0 }
 0x18c   : > { %v462_v3 = vadd.f32 1e-05, %v454_v1  ;;  %v463_v4 = vadd.f32 1e-05, %v455_v2 }
 0x18d   : > { %v440_v5 = vpop.xlane.xlu1 %439  ;;  %v443_v6 = vpop.xlane.xlu0 %442 }
 0x18e   : > { %4913 = vrsqrt.f32 %v462_v3  ;;  %v456_v7 = vmul.f32 0.03125, %v440_v5  ;;  %v457_v8 = vmul.f32 0.03125, %v443_v6 }
 0x18f   : > { %4915 = vrsqrt.f32 %v463_v4 }
 0x190   : > { %v464_v9 = vadd.f32 1e-05, %v456_v7  ;;  %v465_v10 = vadd.f32 1e-05, %v457_v8 }
 0x191   : > { %v446_v11 = vpop.xlane.xlu1 %445  ;;  %v449_v12 = vpop.xlane.xlu0 %448 }
 0x192   : > { %4917 = vrsqrt.f32 %v464_v9  ;;  %v458_v13 = vmul.f32 0.03125, %v446_v11  ;;  %v459_v14 = vmul.f32 0.03125, %v449_v12 }
 0x193   : > { %4919 = vrsqrt.f32 %v465_v10 }
 0x194   : > { %v466_v15 = vadd.f32 1e-05, %v458_v13  ;;  %v467_v16 = vadd.f32 1e-05, %v459_v14 }
 0x195   : > { %v452_v17 = vpop.xlane.xlu1 %451 }
 0x196   : > { %4921 = vrsqrt.f32 %v466_v15  ;;  %v460_v18 = vmul.f32 0.03125, %v452_v17 }
 0x197   : > { %v4912_v19 = vpop.eup %4911  ;;  %4923 = vrsqrt.f32 %v467_v16 }
 0x198   : > { %v468_v23 = vadd.f32 1e-05, %v460_v18  ;;  %v477_v24 = vmul.f32 %v4912_v19, %v5493_v20 }
 0x19a   : > { %4925 = vrsqrt.f32 %v468_v23  ;;  %v492_v26 = vmul.f32 %v4267_v22, %v477_v24  ;;  %v656_v24 = vld [vmem:[#allocation8 + $0x8] sm:$0xff] }
 0x19b   : > { %v4914_v27 = vpop.eup %4913 }
 0x19c   : > { %v4916_v30 = vpop.eup %4915  ;;  %v507_v31 = vadd.f32 %v4268_v25, %v492_v26  ;;  %v478_v32 = vmul.f32 %v4914_v27, %v5501_v28  ;;  %v655_v26 = vld [vmem:[#allocation8] sm:$0xff] }
 0x19d   : > { %v479_v33 = vmul.f32 %v4916_v30, %v5495_v21 }
 0x19e   : > { %4553 = vmatprep.mubr.msk.f32.mxu0 %vm379_vm0, %v507_v31  ;;  %v493_v34 = vmul.f32 %v4267_v22, %v478_v32 }
 0x19f   : > { %v4918_v35 = vpop.eup %4917  ;;  %v494_v36 = vmul.f32 %v4267_v22, %v479_v33 }
 0x1a0   : > { %v4920_v37 = vpop.eup %4919  ;;  %v508_v20 = vadd.f32 %v4268_v25, %v493_v34  ;;  %v480_v40 = vmul.f32 %v4918_v35, %v5503_v29 }
 0x1a1   : > { %v509_v41 = vadd.f32 %v4268_v25, %v494_v36  ;;  %v481_v42 = vmul.f32 %v4920_v37, %v5511_v38 }
 0x1a2   : > { %4554 = vmatmul.mubr.msk.f32.vlgmr.msra.gmra.mxu0 %vm379_vm0, %v508_v20  ;;  %v495_v43 = vmul.f32 %v4267_v22, %v480_v40 }
 0x1a3   : > { %v4922_v44 = vpop.eup %4921  ;;  %4556 = vmatprep.mubr.msk.f32.mxu0 %vm379_vm0, %v509_v41  ;;  %v496_v28 = vmul.f32 %v4267_v22, %v481_v42 }
 0x1a4   : > { %v4924_v21 = vpop.eup %4923  ;;  %v510_v45 = vadd.f32 %v4268_v25, %v495_v43  ;;  %v482_v46 = vmul.f32 %v4922_v44, %v5513_v39 }
 0x1a5   : > { %v511_v47 = vadd.f32 %v4268_v25, %v496_v28  ;;  %v483_v50 = vmul.f32 %v4924_v21, %v5521_v48  ;;  %v4269_v48 = vld [vmem:[%s6408_s4] ss:$0 sm:$0xff] }
 0x1a6   : > { %4557 = vmatmul.mubr.msk.f32.gmra.mxu0 %vm379_vm0, %v510_v45  ;;  %v497_v29 = vmul.f32 %v4267_v22, %v482_v46 }
 0x1a7   : > { %v4926_v51 = vpop.eup %4925  ;;  %4559 = vmatprep.mubr.msk.f32.mxu1 %vm379_vm0, %v511_v47  ;;  %v498_v38 = vmul.f32 %v4267_v22, %v483_v50 }
 0x1a8   : > { %v512_v52 = vadd.f32 %v4268_v25, %v497_v29  ;;  %v484_v53 = vmul.f32 %v4926_v51, %v5523_v49 }
 0x1a9   : > { %v513_v54 = vadd.f32 %v4268_v25, %v498_v38 }
 0x1aa   : > { %4560 = vmatmul.mubr.msk.f32.vlgmr.msra.gmra.mxu1 %vm379_vm0, %v512_v52  ;;  %v499_v55 = vmul.f32 %v4267_v22, %v484_v53 }
 0x1ab   : > { %4562 = vmatprep.mubr.msk.f32.mxu1 %vm379_vm0, %v513_v54 }
 0x1ac   : > { %v514_v39 = vadd.f32 %v4268_v25, %v499_v55 }
 0x1ae   : > { %4563 = vmatmul.mubr.msk.f32.gmra.mxu1 %vm379_vm0, %v514_v39 }
 0x262   : > { %v4555_v56 = vpop.f32.mrf.mxu0 }
 0x263   : > { %v5558_v57 = vadd.f32 %v4555_v56, %v4269_v48 }
 0x264   : > { %v616_v58 = vpop.f32.mrf.mxu0 }
 0x265   : > { %v5560_v59 = vadd.f32 %v4269_v48, %v616_v58  ;;  %667 = vrot.lane.b32.xlu0 %v5558_v57, %s5249_s19 }
 0x266   : > { %v4558_v49 = vpop.f32.mrf.mxu0 }
 0x267   : > { %665 = vrot.lane.b32.xlu1 %v5560_v59, %s5249_s19  ;;  %4569 = vmatprep.mubr.msk.f32.mxu1 %vm669_vm1, %v5560_v59  ;;  %v5566_v60 = vadd.f32 %v4558_v49, %v4269_v48 }
 0x268   : > { %v626_v61 = vpop.f32.mrf.mxu0 }
 0x269   : > { %v5571_v1 = vadd.f32 %v4269_v48, %v626_v61 }
 0x26a   : > { %v4561_v62 = vpop.f32.mrf.mxu1 }
 0x26b   : > { %v5568_v63 = vadd.f32 %v4561_v62, %v4269_v48  ;;  %757 = vrot.lane.b32.xlu1 %v5566_v60, %s5249_s19 }
 0x26c   : > { %v636_v0 = vpop.f32.mrf.mxu1 }
 0x26d   : > { %v5573_v2 = vadd.f32 %v4269_v48, %v636_v0  ;;  %846 = vrot.lane.b32.xlu0 %v5568_v63, %s5249_s19 }
 0x26e   : > { %v4564_v3 = vpop.f32.mrf.mxu1 }
 0x26f   : > { %v5576_v4 = vadd.f32 %v4564_v3, %v4269_v48  ;;  %755 = vrot.lane.b32.xlu1 %v5571_v1, %s5249_s19  ;;  %4583 = vmatprep.mubr.msk.f32.mxu0 %vm669_vm1, %v5573_v2 }
 0x270   : > { %v646_v5 = vpop.f32.mrf.mxu1 }
 0x271   : > { %935 = vrot.lane.b32.xlu0 %v5576_v4, %s5249_s19  ;;  %v5583_v6 = vadd.f32 %v4269_v48, %v646_v5 }
 0x273   : > { %844 = vrot.lane.b32.xlu1 %v5573_v2, %s5249_s19 }
 0x275   : > { %1095 = vrot.lane.b32.xlu0 %v5558_v57, %s5250_s26 }
 0x277   : > { %933 = vrot.lane.b32.xlu1 %v5583_v6, %s5249_s19  ;;  %s5261_s19 = smov 16  }
 0x279   : > { %1356 = vrot.lane.b32.xlu0 %v5576_v4, %s5250_s26 }
 0x27b   : > { %1093 = vrot.lane.b32.xlu1 %v5560_v59, %s5250_s26 }
 0x27d   : > { %1554 = vrot.lane.b32.xlu0 %v5566_v60, %s5251_s10 }
 0x27f   : > { %1182 = vrot.lane.b32.xlu1 %v5566_v60, %s5250_s26 }
 0x281   : > { %1180 = vrot.lane.b32.xlu0 %v5571_v1, %s5250_s26 }
 0x283   : > { %1269 = vrot.lane.b32.xlu1 %v5568_v63, %s5250_s26 }
 0x285   : > { %1354 = vrot.lane.b32.xlu0 %v5583_v6, %s5250_s26 }
 0x287   : > { %1267 = vrot.lane.b32.xlu1 %v5573_v2, %s5250_s26  ;;  %s5262_s26 = smov 24  }
 0x289   : > { %1552 = vrot.lane.b32.xlu0 %v5571_v1, %s5251_s10 }
 0x28b   : > { %1463 = vrot.lane.b32.xlu1 %v5558_v57, %s5251_s10 }
 0x28f   : > { %1461 = vrot.lane.b32.xlu1 %v5560_v59, %s5251_s10 }
 0x293   : > { %1457 = vrot.lane.b32.xlu1 %v5560_v59, %s5252_s23 }
 0x297   : > { %1645 = vrot.lane.b32.xlu1 %v5568_v63, %s5251_s10 }
 0x2d7   : > { %v668_v7 = vpop.permute.xlu0 %667 }
 0x2d8   : > { %4565 = vmatprep.subr.msk.mxu1 %vm669_vm1, %v668_v7 }
 0x2d9   : > { %v666_v8 = vpop.permute.xlu1 %665  ;;  %4566 = vmatpush3.xpose.msk.msra.mxu1 %vm669_vm1, %v668_v7 }
 0x2da   : > { %4567 = vmatprep.subr.msk.mxu1 %vm669_vm1, %v666_v8 }
 0x2dd   : > { %v758_v9 = vpop.permute.xlu1 %757  ;;  %4568 = vmatpush3.xpose.msk.msra.mxu1 %vm669_vm1, %v666_v8 }
 0x2de   : > { %4572 = vmatprep.subr.msk.mxu1 %vm669_vm1, %v758_v9 }
 0x2df   : > { %v847_v10 = vpop.permute.xlu0 %846 }
 0x2e0   : > { %4570 = vmatmul.mubr.msk.f32.vlgmr.msra.gmra.mxu1 %vm669_vm1, %v5558_v57  ;;  %4579 = vmatprep.subr.msk.mxu0 %vm669_vm1, %v847_v10 }
 0x2e1   : > { %v756_v11 = vpop.permute.xlu1 %755  ;;  %4573 = vmatpush3.xpose.msk.msra.mxu1 %vm669_vm1, %v758_v9  ;;  %4576 = vmatprep.mubr.msk.f32.mxu1 %vm669_vm1, %v5571_v1 }
 0x2e2   : > { %4580 = vmatpush3.xpose.msk.msra.mxu0 %vm669_vm1, %v847_v10  ;;  %4574 = vmatprep.subr.msk.mxu1 %vm669_vm1, %v756_v11 }
 0x2e3   : > { %v936_v12 = vpop.permute.xlu0 %935 }
 0x2e5   : > { %v845_v13 = vpop.permute.xlu1 %844  ;;  %4575 = vmatpush3.xpose.msk.msra.mxu1 %vm669_vm1, %v756_v11 }
 0x2e6   : > { %4581 = vmatprep.subr.msk.mxu0 %vm669_vm1, %v845_v13  ;;  %4586 = vmatprep.subr.msk.mxu1 %vm669_vm1, %v936_v12 }
 0x2e7   : > { %4582 = vmatpush3.xpose.msk.msra.mxu0 %vm669_vm1, %v845_v13  ;;  %v1096_v14 = vpop.permute.xlu0 %1095 }
 0x2e8   : > { %4577 = vmatmul.mubr.msk.f32.vlgmr.msra.gmra.mxu1 %vm669_vm1, %v5566_v60  ;;  %4593 = vmatprep.subr.mxu0 %v1096_v14 }
 0x2e9   : > { %v934_v15 = vpop.permute.xlu1 %933  ;;  %4587 = vmatpush3.xpose.msk.msra.mxu1 %vm669_vm1, %v936_v12  ;;  %4590 = vmatprep.mubr.msk.f32.mxu1 %vm669_vm1, %v5583_v6 }
 0x2ea   : > { %4584 = vmatmul.mubr.msk.f32.vlgmr.msra.gmra.mxu0 %vm669_vm1, %v5568_v63  ;;  %4588 = vmatprep.subr.msk.mxu1 %vm669_vm1, %v934_v15 }
 0x2eb   : > { %4594 = vmatpush3.msra.mxu0 %v1096_v14  ;;  %v5631_v16 = vpop.permute.xlu0 %1356 }
 0x2ed   : > { %v1094_v17 = vpop.permute.xlu1 %1093  ;;  %4589 = vmatpush3.xpose.msk.msra.mxu1 %vm669_vm1, %v934_v15 }
 0x2ee   : > { %4595 = vmatprep.subr.mxu0 %v1094_v17 }
 0x2ef   : > { %4596 = vmatpush3.msra.mxu0 %v1094_v17  ;;  %v5634_v18 = vpop.permute.xlu0 %1554 }
 0x2f0   : > { %4591 = vmatmul.mubr.msk.f32.vlgmr.msra.gmra.mxu1 %vm669_vm1, %v5576_v4 }
 0x2f1   : > { %v1183_v19 = vpop.permute.xlu1 %1182 }
 0x2f2   : > { %4600 = vmatprep.subr.mxu1 %v1183_v19 }
 0x2f3   : > { %4601 = vmatpush3.msra.mxu1 %v1183_v19  ;;  %v1181_v22 = vpop.permute.xlu0 %1180 }
 0x2f4   : > { %4602 = vmatprep.subr.mxu1 %v1181_v22 }
 0x2f5   : > { %v5638_v23 = vpop.permute.xlu1 %1269  ;;  %4603 = vmatpush3.msra.mxu1 %v1181_v22 }
 0x2f6   : > { %4607 = vmatprep.subr.mxu0 %v5638_v23  ;;  %4614 = vmatprep.subr.mxu1 %v5631_v16 }
 0x2f7   : > { %v5714_v55 = vpop.permute.xlu0 %1354 }
 0x2f9   : > { %v1268_v38 = vpop.permute.xlu1 %1267 }
 0x2fb   : > { %v5718_v48 = vpop.permute.xlu0 %1552 }
 0x2fd   : > { %v1464_v52 = vpop.permute.xlu1 %1463 }
 0x301   : > { %v1462_v53 = vpop.permute.xlu1 %1461 }
 0x305   : > { %v1458_v54 = vpop.permute.xlu1 %1457 }
 0x309   : > { %v5716_v39 = vpop.permute.xlu1 %1645 }
 0x3a0   : > { %v4571_v25 = vpop.f32.mrf.mxu1 }
 0x3a1   : > { %v5642_v27 = vadd.f32 %v4571_v25, %v656_v24 }
 0x3a2   : > { %v744_v30 = vpop.f32.mrf.mxu1 }
 0x3a3   : > { %v5644_v31 = vadd.f32 %v744_v30, %v655_v26  ;;  %v1024_v32 = vsel %vm1020_vm2, %v5642_v27, -inf }
 0x3a4   : > { %1025 = vmax.xlane.f32.xlu1 %v1024_v32 }
 0x3a5   : > { %v1021_v33 = vsel %vm1020_vm2, %v5644_v31, -inf }
 0x3a6   : > { %1022 = vmax.xlane.f32.xlu0 %v1021_v33 }
 0x3a8   : > { %v4578_v34 = vpop.f32.mrf.mxu1 }
 0x3a9   : > { %v5656_v42 = vadd.f32 %v4578_v34, %v656_v24 }
 0x3aa   : > { %v4585_v35 = vpop.f32.mrf.mxu0  ;;  %v833_v41 = vpop.f32.mrf.mxu1 }
 0x3ab   : > { %v5650_v36 = vadd.f32 %v4585_v35, %v656_v24  ;;  %v5662_v21 = vadd.f32 %v833_v41, %v655_v26  ;;  %v1030_v45 = vsel %vm1020_vm2, %v5656_v42, -inf }
 0x3ac   : > { %v922_v37 = vpop.f32.mrf.mxu0 }
 0x3ad   : > { %v5652_v20 = vadd.f32 %v922_v37, %v655_v26  ;;  %v1036_v40 = vsel %vm1020_vm2, %v5650_v36, -inf  ;;  %v1027_v29 = vsel %vm1020_vm2, %v5662_v21, -inf }
 0x3ae   : > { %1037 = vmax.xlane.f32.xlu1 %v1036_v40 }
 0x3af   : > { %v1033_v43 = vsel %vm1020_vm2, %v5652_v20, -inf }
 0x3b0   : > { %1034 = vmax.xlane.f32.xlu0 %v1033_v43  ;;  %v4592_v44 = vpop.f32.mrf.mxu1 }
 0x3b1   : > { %v5660_v28 = vadd.f32 %v4592_v44, %v656_v24 }
 0x3b2   : > { %v1011_v47 = vpop.f32.mrf.mxu1 }
 0x3b3   : > { %v1042_v46 = vsel %vm1020_vm2, %v5660_v28, -inf  ;;  %v5668_v50 = vadd.f32 %v1011_v47, %v655_v26 }
 0x3b4   : > { %1031 = vmax.xlane.f32.xlu0 %v1030_v45  ;;  %1043 = vmax.xlane.f32.xlu1 %v1042_v46 }
 0x3b5   : > { %v1039_v51 = vsel %vm1020_vm2, %v5668_v50, -inf }
 0x3b8   : > { %1028 = vmax.xlane.f32.xlu0 %v1027_v29 }
 0x3bc   : > { %1040 = vmax.xlane.f32.xlu0 %v1039_v51 }
 0x3c5   : > { %1548 = vrot.lane.b32.xlu1 %v5571_v1, %s5252_s23 }
 0x3c9   : > { %1736 = vrot.lane.b32.xlu1 %v5576_v4, %s5251_s10 }
 0x3cd   : > { %1639 = vrot.lane.b32.xlu1 %v5573_v2, %s5252_s23 }
 0x3d1   : > { %1734 = vrot.lane.b32.xlu1 %v5583_v6, %s5251_s10 }
 0x3d2   : > { %1459 = vrot.lane.b32.xlu0 %v5558_v57, %s5252_s23 }
 0x3d5   : > { %1732 = vrot.lane.b32.xlu1 %v5576_v4, %s5252_s23 }
 0x3d6   : > { %1643 = vrot.lane.b32.xlu0 %v5573_v2, %s5251_s10 }
 0x3d9   : > { %1893 = vrot.lane.b32.xlu1 %v5560_v59, %s5253_s14 }
 0x3da   : > { %1550 = vrot.lane.b32.xlu0 %v5566_v60, %s5252_s23 }
 0x3dd   : > { %1982 = vrot.lane.b32.xlu1 %v5566_v60, %s5253_s14 }
 0x3de   : > { %1641 = vrot.lane.b32.xlu0 %v5568_v63, %s5252_s23 }
 0x3e1   : > { %2069 = vrot.lane.b32.xlu1 %v5568_v63, %s5253_s14 }
 0x3e2   : > { %1730 = vrot.lane.b32.xlu0 %v5583_v6, %s5252_s23 }
 0x3e5   : > { %2067 = vrot.lane.b32.xlu1 %v5573_v2, %s5253_s14 }
 0x3e6   : > { %1895 = vrot.lane.b32.xlu0 %v5558_v57, %s5253_s14 }
 0x3e9   : > { %2263 = vrot.lane.b32.xlu1 %v5558_v57, %s5254_s20 }
 0x3ea   : > { %1980 = vrot.lane.b32.xlu0 %v5571_v1, %s5253_s14 }
 0x3ed   : > { %2261 = vrot.lane.b32.xlu1 %v5560_v59, %s5254_s20 }
 0x3ee   : > { %2156 = vrot.lane.b32.xlu0 %v5576_v4, %s5253_s14 }
 0x3f1   : > { %2257 = vrot.lane.b32.xlu1 %v5560_v59, %s5255_s11 }
 0x3f2   : > { %2154 = vrot.lane.b32.xlu0 %v5583_v6, %s5253_s14  ;;  %s6328_s14 = scalar_lea.vmem [#allocation10], %s4262_s5  ;;  %s4392_s5 = sshll.u32 %s5331_s9, 10 }
 0x3f3   : > { %s4135_s9 = scalar_lea.sflag [#allocation4], %s5457_s3 }
 0x3f5   : > { %2445 = vrot.lane.b32.xlu1 %v5568_v63, %s5254_s20 }
 0x3f6   : > { %2354 = vrot.lane.b32.xlu0 %v5566_v60, %s5254_s20 }
 0x3fa   : > { %2352 = vrot.lane.b32.xlu0 %v5571_v1, %s5254_s20 }
 0x42d   : > { %v1026_v56 = vpop.xlane.xlu1 %1025 }
 0x42e   : > { %v1046_v58 = vsub.f32 %v5642_v27, %v1026_v56 }
 0x42f   : > { %v1023_v49 = vpop.xlane.xlu0 %1022 }
 0x430   : > { %v1045_v61 = vsub.f32 %v5644_v31, %v1023_v49  ;;  %v1055_v62 = vmul.f32 1.442695, %v1046_v58 }
 0x432   : > { %v1053_v0 = vmul.f32 1.442695, %v1045_v61 }
 0x434   : > { %4927 = vpow2.f32 %v1053_v0 }
 0x435   : > { %4929 = vpow2.f32 %v1055_v62 }
 0x437   : > { %v1038_v3 = vpop.xlane.xlu1 %1037 }
 0x438   : > { %v1050_v5 = vsub.f32 %v5650_v36, %v1038_v3 }
 0x439   : > { %v1035_v7 = vpop.xlane.xlu0 %1034 }
 0x43a   : > { %v1049_v8 = vsub.f32 %v5652_v20, %v1035_v7  ;;  %v1063_v9 = vmul.f32 1.442695, %v1050_v5 }
 0x43c   : > { %v1061_v10 = vmul.f32 1.442695, %v1049_v8 }
 0x43d   : > { %v1044_v11 = vpop.xlane.xlu1 %1043  ;;  %v1032_v12 = vpop.xlane.xlu0 %1031 }
 0x43e   : > { %4931 = vpow2.f32 %v1061_v10  ;;  %v1048_v13 = vsub.f32 %v5656_v42, %v1032_v12  ;;  %v1052_v25 = vsub.f32 %v5660_v28, %v1044_v11 }
 0x43f   : > { %4933 = vpow2.f32 %v1063_v9 }
 0x440   : > { %v1059_v24 = vmul.f32 1.442695, %v1048_v13  ;;  %v1067_v32 = vmul.f32 1.442695, %v1052_v25 }
 0x441   : > { %v5725_v14 = vpop.eup %4927  ;;  %v1549_v15 = vpop.permute.xlu1 %1548 }
 0x442   : > { %v1029_v17 = vpop.xlane.xlu0 %1028  ;;  %v5727_v19 = vpop.eup %4929  ;;  %4597 = vmatprep.mubr.msk.f32.mxu0 %vm1020_vm2, %v5725_v14 }
 0x443   : > { %v1047_v22 = vsub.f32 %v5662_v21, %v1029_v17  ;;  %4598 = vmatmul.mubr.msk.f32.vlgmr.msra.gmra.mxu0 %vm1020_vm2, %v5727_v19 }
 0x444   : > { %4608 = vmatpush3.msra.mxu0 %v5638_v23 }
 0x445   : > { %v1057_v26 = vmul.f32 1.442695, %v1047_v22  ;;  %4609 = vmatprep.subr.mxu0 %v1268_v38  ;;  %v1737_v27 = vpop.permute.xlu1 %1736 }
 0x446   : > { %v1041_v30 = vpop.xlane.xlu0 %1040  ;;  %4610 = vmatpush3.msra.mxu0 %v1268_v38 }
 0x447   : > { %4935 = vpow2.f32 %v1057_v26  ;;  %v1051_v31 = vsub.f32 %v5668_v50, %v1041_v30  ;;  %4621 = vmatprep.subr.msk.mxu0 %vm669_vm1, %v1464_v52 }
 0x448   : > { %4937 = vpow2.f32 %v1059_v24 }
 0x449   : > { %v1065_v33 = vmul.f32 1.442695, %v1051_v31  ;;  %v1640_v34 = vpop.permute.xlu1 %1639 }
 0x44a   : > { %v1460_v35 = vpop.permute.xlu0 %1459 }
 0x44b   : > { %4939 = vpow2.f32 %v1065_v33  ;;  %v5738_v36 = vpop.eup %4931 }
 0x44c   : > { %v5740_v37 = vpop.eup %4933  ;;  %4941 = vpow2.f32 %v1067_v32  ;;  %4611 = vmatprep.mubr.msk.f32.mxu0 %vm1020_vm2, %v5738_v36 }
 0x44d   : > { %v1735_v23 = vpop.permute.xlu1 %1734  ;;  %4612 = vmatmul.mubr.msk.f32.vlgmr.msra.gmra.mxu0 %vm1020_vm2, %v5740_v37 }
 0x44e   : > { %v1644_v20 = vpop.permute.xlu0 %1643  ;;  %4622 = vmatpush3.xpose.msk.msra.mxu0 %vm669_vm1, %v1464_v52  ;;  %4625 = vmatprep.mubr.msk.f32.mxu0 %vm669_vm1, %v1458_v54  ;;  %v658_v54 = vld [vmem:[#allocation8 + $0x18] sm:$0xff] }
 0x44f   : > { %4623 = vmatprep.subr.msk.mxu0 %vm669_vm1, %v1462_v53 }
 0x451   : > { %v1733_v40 = vpop.permute.xlu1 %1732 }
 0x452   : > { %v1551_v41 = vpop.permute.xlu0 %1550  ;;  %4624 = vmatpush3.xpose.msk.msra.mxu0 %vm669_vm1, %v1462_v53 }
 0x453   : > { %4635 = vmatprep.subr.msk.mxu0 %vm669_vm1, %v5716_v39 }
 0x454   : > { %v5750_v42 = vpop.eup %4935 }
 0x455   : > { %v5754_v43 = vpop.eup %4937  ;;  %4604 = vmatprep.mubr.msk.f32.mxu1 %vm1020_vm2, %v5750_v42  ;;  %4626 = vmatmul.mubr.msk.f32.vlgmr.msra.gmra.mxu0 %vm669_vm1, %v1460_v35  ;;  %v1894_v44 = vpop.permute.xlu1 %1893 }
 0x456   : > { %4605 = vmatmul.mubr.msk.f32.vlgmr.msra.gmra.mxu1 %vm1020_vm2, %v5754_v43  ;;  %v1642_v28 = vpop.permute.xlu0 %1641  ;;  %4636 = vmatpush3.xpose.msk.msra.mxu0 %vm669_vm1, %v5716_v39 }
 0x457   : > { %4615 = vmatpush3.msra.mxu1 %v5631_v16  ;;  %4639 = vmatprep.mubr.msk.f32.mxu0 %vm669_vm1, %v1640_v34 }
 0x458   : > { %v5764_v21 = vpop.eup %4939  ;;  %4616 = vmatprep.subr.mxu1 %v5714_v55  ;;  %4637 = vmatprep.subr.msk.mxu0 %vm669_vm1, %v1644_v20 }
 0x459   : > { %4617 = vmatpush3.msra.mxu1 %v5714_v55  ;;  %v5770_v45 = vpop.eup %4941  ;;  %4618 = vmatprep.mubr.msk.f32.mxu1 %vm1020_vm2, %v5764_v21  ;;  %v1983_v46 = vpop.permute.xlu1 %1982 }
 0x45a   : > { %4628 = vmatprep.subr.msk.mxu1 %vm669_vm1, %v5634_v18  ;;  %v1731_v16 = vpop.permute.xlu0 %1730  ;;  %4619 = vmatmul.mubr.msk.f32.vlgmr.msra.gmra.mxu1 %vm1020_vm2, %v5770_v45 }
 0x45b   : > { %4638 = vmatpush3.xpose.msk.msra.mxu0 %vm669_vm1, %v1644_v20  ;;  %4629 = vmatpush3.xpose.msk.msra.mxu1 %vm669_vm1, %v5634_v18 }
 0x45c   : > { %4632 = vmatprep.mubr.msk.f32.mxu1 %vm669_vm1, %v1549_v15  ;;  %4630 = vmatprep.subr.msk.mxu1 %vm669_vm1, %v5718_v48 }
 0x45d   : > { %v5788_v50 = vpop.permute.xlu1 %2069 }
 0x45e   : > { %4640 = vmatmul.mubr.msk.f32.vlgmr.msra.gmra.mxu0 %vm669_vm1, %v1642_v28  ;;  %v1896_v47 = vpop.permute.xlu0 %1895 }
 0x45f   : > { %4649 = vmatprep.subr.mxu0 %v1896_v47  ;;  %4631 = vmatpush3.xpose.msk.msra.mxu1 %vm669_vm1, %v5718_v48  ;;  %v657_v48 = vld [vmem:[#allocation8 + $0x10] sm:$0xff] }
 0x460   : > { %4650 = vmatpush3.msra.mxu0 %v1896_v47  ;;  %4642 = vmatprep.subr.msk.mxu1 %vm669_vm1, %v1737_v27 }
 0x461   : > { %4651 = vmatprep.subr.mxu0 %v1894_v44  ;;  %v2068_v34 = vpop.permute.xlu1 %2067 }
 0x462   : > { %4652 = vmatpush3.msra.mxu0 %v1894_v44  ;;  %4633 = vmatmul.mubr.msk.f32.vlgmr.msra.gmra.mxu1 %vm669_vm1, %v1551_v41  ;;  %v1981_v18 = vpop.permute.xlu0 %1980 }
 0x463   : > { %4663 = vmatprep.subr.mxu0 %v5788_v50  ;;  %4643 = vmatpush3.xpose.msk.msra.mxu1 %vm669_vm1, %v1737_v27 }
 0x464   : > { %4646 = vmatprep.mubr.msk.f32.mxu1 %vm669_vm1, %v1731_v16  ;;  %4644 = vmatprep.subr.msk.mxu1 %vm669_vm1, %v1735_v23 }
 0x465   : > { %v2264_v35 = vpop.permute.xlu1 %2263 }
 0x466   : > { %v5797_v29 = vpop.permute.xlu0 %2156 }
 0x467   : > { %4645 = vmatpush3.xpose.msk.msra.mxu1 %vm669_vm1, %v1735_v23 }
 0x468   : > { %4656 = vmatprep.subr.mxu1 %v1983_v46 }
 0x469   : > { %v2262_v23 = vpop.permute.xlu1 %2261 }
 0x46a   : > { %4647 = vmatmul.mubr.msk.f32.vlgmr.msra.gmra.mxu1 %vm669_vm1, %v1733_v40  ;;  %v5888_v20 = vpop.permute.xlu0 %2154 }
 0x46b   : > { %4657 = vmatpush3.msra.mxu1 %v1983_v46 }
 0x46c   : > { %4658 = vmatprep.subr.mxu1 %v1981_v18 }
 0x46d   : > { %4659 = vmatpush3.msra.mxu1 %v1981_v18  ;;  %v2258_v40 = vpop.permute.xlu1 %2257 }
 0x46e   : > { %4670 = vmatprep.subr.mxu1 %v5797_v29  ;;  %v5890_v41 = vpop.permute.xlu0 %2354 }
 0x471   : > { %v5892_v44 = vpop.permute.xlu1 %2445 }
 0x472   : > { %v5894_v28 = vpop.permute.xlu0 %2352 }
 0x503   : > { %v5800_v51 = vpop.f32.mrf.mxu0 }
 0x505   : > { %v5802_v38 = vpop.f32.mrf.mxu0 }
 0x50d   : > { %v5804_v52 = vpop.f32.mrf.mxu0 }
 0x50e   : > { %6437 = vst [vmem:[#allocation15_spill] sm:$0xff] %v5804_v52 }
 0x50f   : > { %v5806_v53 = vpop.f32.mrf.mxu0 }
 0x510   : > { %6438 = vst [vmem:[#allocation16_spill] sm:$0xff] %v5806_v53 }
 0x515   : > { %v4627_v55 = vpop.f32.mrf.mxu0 }
 0x516   : > { %v5808_v39 = vpop.f32.mrf.mxu1  ;;  %v5810_v56 = vadd.f32 %v4627_v55, %v658_v54 }
 0x517   : > { %6439 = vst [vmem:[#allocation17_spill] sm:$0xff] %v5808_v39  ;;  %v1539_v58 = vpop.f32.mrf.mxu0 }
 0x518   : > { %v5812_v49 = vadd.f32 %v1539_v58, %v657_v48  ;;  %v5814_v61 = vpop.f32.mrf.mxu1  ;;  %v1824_v62 = vsel %vm1020_vm2, %v5810_v56, -inf }
 0x519   : > { %1825 = vmax.xlane.f32.xlu1 %v1824_v62 }
 0x51a   : > { %v1821_v0 = vsel %vm1020_vm2, %v5812_v49, -inf  ;;  %v5820_v3 = vpop.f32.mrf.mxu1 }
 0x51b   : > { %1822 = vmax.xlane.f32.xlu0 %v1821_v0  ;;  %6440 = vst [vmem:[#allocation18_spill] sm:$0xff] %v5820_v3 }
 0x51c   : > { %v5824_v9 = vpop.f32.mrf.mxu1 }
 0x51d   : > { %6441 = vst [vmem:[#allocation19_spill] sm:$0xff] %v5824_v9 }
 0x51e   : > { %v4641_v5 = vpop.f32.mrf.mxu0 }
 0x51f   : > { %v5822_v7 = vadd.f32 %v4641_v5, %v658_v54 }
 0x520   : > { %v1721_v8 = vpop.f32.mrf.mxu0 }
 0x521   : > { %v5826_v10 = vadd.f32 %v1721_v8, %v657_v48  ;;  %v1836_v11 = vsel %vm1020_vm2, %v5822_v7, -inf }
 0x522   : > { %1837 = vmax.xlane.f32.xlu1 %v1836_v11  ;;  %v4634_v12 = vpop.f32.mrf.mxu1 }
 0x523   : > { %v1833_v13 = vsel %vm1020_vm2, %v5826_v10, -inf  ;;  %v5832_v15 = vadd.f32 %v4634_v12, %v658_v54 }
 0x524   : > { %1834 = vmax.xlane.f32.xlu0 %v1833_v13  ;;  %v1630_v17 = vpop.f32.mrf.mxu1 }
 0x525   : > { %v5834_v22 = vadd.f32 %v1630_v17, %v657_v48  ;;  %v1830_v24 = vsel %vm1020_vm2, %v5832_v15, -inf }
 0x527   : > { %v1827_v26 = vsel %vm1020_vm2, %v5834_v22, -inf }
 0x528   : > { %1831 = vmax.xlane.f32.xlu0 %v1830_v24 }
 0x52a   : > { %v4648_v25 = vpop.f32.mrf.mxu1 }
 0x52b   : > { %v5840_v27 = vadd.f32 %v4648_v25, %v658_v54 }
 0x52c   : > { %1828 = vmax.xlane.f32.xlu0 %v1827_v26  ;;  %v1812_v30 = vpop.f32.mrf.mxu1 }
 0x52d   : > { %v5842_v31 = vadd.f32 %v1812_v30, %v657_v48  ;;  %v1842_v32 = vsel %vm1020_vm2, %v5840_v27, -inf }
 0x52e   : > { %1843 = vmax.xlane.f32.xlu1 %v1842_v32 }
 0x52f   : > { %v1839_v33 = vsel %vm1020_vm2, %v5842_v31, -inf }
 0x530   : > { %1840 = vmax.xlane.f32.xlu0 %v1839_v33 }
 0x53f   : > { %2348 = vrot.lane.b32.xlu1 %v5571_v1, %s5255_s11 }
 0x543   : > { %2536 = vrot.lane.b32.xlu1 %v5576_v4, %s5254_s20 }
 0x546   : > { %2259 = vrot.lane.b32.xlu0 %v5558_v57, %s5255_s11 }
 0x547   : > { %2439 = vrot.lane.b32.xlu1 %v5573_v2, %s5255_s11 }
 0x54a   : > { %2443 = vrot.lane.b32.xlu0 %v5573_v2, %s5254_s20 }
 0x54b   : > { %2534 = vrot.lane.b32.xlu1 %v5583_v6, %s5254_s20  ;;  %s4149_s20 = sshll.u32 %s6328_s14, 4  ;;  %s6358_s20 = int_to_ptr.vmem [resolvable:$true] %s4149_s20 }
 0x54e   : > { %2350 = vrot.lane.b32.xlu0 %v5566_v60, %s5255_s11 }
 0x54f   : > { %2532 = vrot.lane.b32.xlu1 %v5576_v4, %s5255_s11 }
 0x552   : > { %2441 = vrot.lane.b32.xlu0 %v5568_v63, %s5255_s11 }
 0x553   : > { %2693 = vrot.lane.b32.xlu1 %v5560_v59, %s5256_s13 }
 0x556   : > { %2530 = vrot.lane.b32.xlu0 %v5583_v6, %s5255_s11 }
 0x557   : > { %2782 = vrot.lane.b32.xlu1 %v5566_v60, %s5256_s13 }
 0x55a   : > { %2695 = vrot.lane.b32.xlu0 %v5558_v57, %s5256_s13 }
 0x55b   : > { %2869 = vrot.lane.b32.xlu1 %v5568_v63, %s5256_s13 }
 0x55e   : > { %2780 = vrot.lane.b32.xlu0 %v5571_v1, %s5256_s13 }
 0x55f   : > { %2867 = vrot.lane.b32.xlu1 %v5573_v2, %s5256_s13 }
 0x562   : > { %2956 = vrot.lane.b32.xlu0 %v5576_v4, %s5256_s13 }
 0x563   : > { %3063 = vrot.lane.b32.xlu1 %v5558_v57, %s5257_s22 }
 0x566   : > { %2954 = vrot.lane.b32.xlu0 %v5583_v6, %s5256_s13 }
 0x567   : > { %3061 = vrot.lane.b32.xlu1 %v5560_v59, %s5257_s22 }
 0x56a   : > { %3154 = vrot.lane.b32.xlu0 %v5566_v60, %s5257_s22 }
 0x56b   : > { %3057 = vrot.lane.b32.xlu1 %v5560_v59, %s5258_s17 }
 0x56e   : > { %3059 = vrot.lane.b32.xlu0 %v5558_v57, %s5258_s17 }
 0x56f   : > { %3152 = vrot.lane.b32.xlu1 %v5571_v1, %s5257_s22 }
 0x5a2   : > { %v1826_v16 = vpop.xlane.xlu1 %1825 }
 0x5a3   : > { %v1846_v46 = vsub.f32 %v5810_v56, %v1826_v16 }
 0x5a4   : > { %v1823_v47 = vpop.xlane.xlu0 %1822 }
 0x5a5   : > { %v1845_v18 = vsub.f32 %v5812_v49, %v1823_v47  ;;  %v1855_v54 = vmul.f32 1.442695, %v1846_v46 }
 0x5a7   : > { %v1853_v55 = vmul.f32 1.442695, %v1845_v18 }
 0x5a9   : > { %4943 = vpow2.f32 %v1853_v55 }
 0x5aa   : > { %4945 = vpow2.f32 %v1855_v54 }
 0x5ab   : > { %v1838_v48 = vpop.xlane.xlu1 %1837 }
 0x5ac   : > { %v1850_v58 = vsub.f32 %v5822_v7, %v1838_v48 }
 0x5ad   : > { %v1835_v62 = vpop.xlane.xlu0 %1834 }
 0x5ae   : > { %v1849_v0 = vsub.f32 %v5826_v10, %v1835_v62  ;;  %v1863_v5 = vmul.f32 1.442695, %v1850_v58 }
 0x5b0   : > { %v1861_v8 = vmul.f32 1.442695, %v1849_v0 }
 0x5b1   : > { %v1832_v11 = vpop.xlane.xlu0 %1831 }
 0x5b2   : > { %4947 = vpow2.f32 %v1861_v8  ;;  %v1848_v56 = vsub.f32 %v5832_v15, %v1832_v11  ;;  %v660_v11 = vld [vmem:[#allocation8 + $0x28] sm:$0xff] }
 0x5b3   : > { %4949 = vpow2.f32 %v1863_v5 }
 0x5b4   : > { %v1859_v17 = vmul.f32 1.442695, %v1848_v56 }
 0x5b5   : > { %v1829_v12 = vpop.xlane.xlu0 %1828 }
 0x5b6   : > { %v1847_v49 = vsub.f32 %v5834_v22, %v1829_v12  ;;  %v5902_v13 = vpop.eup %4943 }
 0x5b7   : > { %v5904_v24 = vpop.eup %4945  ;;  %v1844_v7 = vpop.xlane.xlu1 %1843  ;;  %4653 = vmatprep.mubr.msk.f32.mxu0 %vm1020_vm2, %v5902_v13 }
 0x5b8   : > { %v1857_v25 = vmul.f32 1.442695, %v1847_v49  ;;  %v1852_v10 = vsub.f32 %v5840_v27, %v1844_v7  ;;  %4654 = vmatmul.mubr.msk.f32.vlgmr.msra.gmra.mxu0 %vm1020_vm2, %v5904_v24  ;;  %v659_v49 = vld [vmem:[#allocation8 + $0x20] sm:$0xff] }
 0x5b9   : > { %4664 = vmatpush3.msra.mxu0 %v5788_v50  ;;  %v1841_v15 = vpop.xlane.xlu0 %1840 }
 0x5ba   : > { %4951 = vpow2.f32 %v1857_v25  ;;  %v1851_v22 = vsub.f32 %v5842_v31, %v1841_v15  ;;  %4665 = vmatprep.subr.mxu0 %v2068_v34  ;;  %v1867_v26 = vmul.f32 1.442695, %v1852_v10 }
 0x5bb   : > { %4953 = vpow2.f32 %v1859_v17  ;;  %v2349_v30 = vpop.permute.xlu1 %2348  ;;  %4666 = vmatpush3.msra.mxu0 %v2068_v34 }
 0x5bc   : > { %v1865_v32 = vmul.f32 1.442695, %v1851_v22  ;;  %4677 = vmatprep.subr.msk.mxu0 %vm669_vm1, %v2264_v35 }
 0x5bd   : > { %v2260_v33 = vpop.permute.xlu0 %2259 }
 0x5be   : > { %4955 = vpow2.f32 %v1865_v32 }
 0x5bf   : > { %v5914_v16 = vpop.eup %4947  ;;  %4957 = vpow2.f32 %v1867_v26  ;;  %v2537_v46 = vpop.permute.xlu1 %2536 }
 0x5c0   : > { %v5916_v27 = vpop.eup %4949  ;;  %4667 = vmatprep.mubr.msk.f32.mxu0 %vm1020_vm2, %v5914_v16 }
 0x5c1   : > { %4668 = vmatmul.mubr.msk.f32.vlgmr.msra.gmra.mxu0 %vm1020_vm2, %v5916_v27  ;;  %v2444_v50 = vpop.permute.xlu0 %2443 }
 0x5c2   : > { %4678 = vmatpush3.xpose.msk.msra.mxu0 %vm669_vm1, %v2264_v35  ;;  %4681 = vmatprep.mubr.msk.f32.mxu0 %vm669_vm1, %v2258_v40 }
 0x5c3   : > { %4679 = vmatprep.subr.msk.mxu0 %vm669_vm1, %v2262_v23  ;;  %v2440_v31 = vpop.permute.xlu1 %2439 }
 0x5c5   : > { %v2351_v34 = vpop.permute.xlu0 %2350 }
 0x5c6   : > { %4680 = vmatpush3.xpose.msk.msra.mxu0 %vm669_vm1, %v2262_v23 }
 0x5c7   : > { %v5926_v47 = vpop.eup %4951  ;;  %4691 = vmatprep.subr.msk.mxu0 %vm669_vm1, %v5892_v44  ;;  %v2535_v54 = vpop.permute.xlu1 %2534 }
 0x5c8   : > { %v5930_v18 = vpop.eup %4953  ;;  %4660 = vmatprep.mubr.msk.f32.mxu1 %vm1020_vm2, %v5926_v47 }
 0x5c9   : > { %4682 = vmatmul.mubr.msk.f32.vlgmr.msra.gmra.mxu0 %vm669_vm1, %v2260_v33  ;;  %4661 = vmatmul.mubr.msk.f32.vlgmr.msra.gmra.mxu1 %vm1020_vm2, %v5930_v18  ;;  %v2442_v35 = vpop.permute.xlu0 %2441 }
 0x5ca   : > { %4671 = vmatpush3.msra.mxu1 %v5797_v29  ;;  %4692 = vmatpush3.xpose.msk.msra.mxu0 %vm669_vm1, %v5892_v44 }
 0x5cb   : > { %4695 = vmatprep.mubr.msk.f32.mxu0 %vm669_vm1, %v2440_v31  ;;  %4672 = vmatprep.subr.mxu1 %v5888_v20  ;;  %v5942_v23 = vpop.eup %4955  ;;  %v2533_v40 = vpop.permute.xlu1 %2532 }
 0x5cc   : > { %4693 = vmatprep.subr.msk.mxu0 %vm669_vm1, %v2444_v50  ;;  %4673 = vmatpush3.msra.mxu1 %v5888_v20  ;;  %v5946_v55 = vpop.eup %4957 }
 0x5cd   : > { %4674 = vmatprep.mubr.msk.f32.mxu1 %vm1020_vm2, %v5942_v23  ;;  %4684 = vmatprep.subr.msk.mxu1 %vm669_vm1, %v5890_v41  ;;  %v2531_v29 = vpop.permute.xlu0 %2530 }
 0x5ce   : > { %4675 = vmatmul.mubr.msk.f32.vlgmr.msra.gmra.mxu1 %vm1020_vm2, %v5946_v55  ;;  %4694 = vmatpush3.xpose.msk.msra.mxu0 %vm669_vm1, %v2444_v50 }
 0x5cf   : > { %4685 = vmatpush3.xpose.msk.msra.mxu1 %vm669_vm1, %v5890_v41  ;;  %4688 = vmatprep.mubr.msk.f32.mxu1 %vm669_vm1, %v2349_v30  ;;  %v2694_v20 = vpop.permute.xlu1 %2693 }
 0x5d0   : > { %4686 = vmatprep.subr.msk.mxu1 %vm669_vm1, %v5894_v28 }
 0x5d1   : > { %4696 = vmatmul.mubr.msk.f32.vlgmr.msra.gmra.mxu0 %vm669_vm1, %v2442_v35  ;;  %v2696_v44 = vpop.permute.xlu0 %2695 }
 0x5d2   : > { %4705 = vmatprep.subr.mxu0 %v2696_v44 }
 0x5d3   : > { %4687 = vmatpush3.xpose.msk.msra.mxu1 %vm669_vm1, %v5894_v28  ;;  %v2783_v48 = vpop.permute.xlu1 %2782  ;;  %4706 = vmatpush3.msra.mxu0 %v2696_v44 }
 0x5d4   : > { %4698 = vmatprep.subr.msk.mxu1 %vm669_vm1, %v2537_v46  ;;  %4707 = vmatprep.subr.mxu0 %v2694_v20 }
 0x5d5   : > { %4708 = vmatpush3.msra.mxu0 %v2694_v20  ;;  %v2781_v28 = vpop.permute.xlu0 %2780 }
 0x5d6   : > { %4689 = vmatmul.mubr.msk.f32.vlgmr.msra.gmra.mxu1 %vm669_vm1, %v2351_v34 }
 0x5d7   : > { %4699 = vmatpush3.xpose.msk.msra.mxu1 %vm669_vm1, %v2537_v46  ;;  %4702 = vmatprep.mubr.msk.f32.mxu1 %vm669_vm1, %v2531_v29  ;;  %v5968_v41 = vpop.permute.xlu1 %2869 }
 0x5d8   : > { %4700 = vmatprep.subr.msk.mxu1 %vm669_vm1, %v2535_v54  ;;  %4719 = vmatprep.subr.mxu0 %v5968_v41 }
 0x5d9   : > { %v5973_v58 = vpop.permute.xlu0 %2956 }
 0x5db   : > { %4701 = vmatpush3.xpose.msk.msra.mxu1 %vm669_vm1, %v2535_v54 }
 0x5dc   : > { %4712 = vmatprep.subr.mxu1 %v2783_v48 }
 0x5de   : > { %4703 = vmatmul.mubr.msk.f32.vlgmr.msra.gmra.mxu1 %vm669_vm1, %v2533_v40 }
 0x5df   : > { %4713 = vmatpush3.msra.mxu1 %v2783_v48 }
 0x5e0   : > { %4714 = vmatprep.subr.mxu1 %v2781_v28 }
 0x5e1   : > { %4715 = vmatpush3.msra.mxu1 %v2781_v28 }
 0x5e2   : > { %4726 = vmatprep.subr.mxu1 %v5973_v58 }
 0x678   : > { %v5976_v62 = vpop.f32.mrf.mxu0 }
 0x67a   : > { %v5978_v0 = vpop.f32.mrf.mxu0 }
 0x681   : > { %v5980_v5 = vpop.f32.mrf.mxu0 }
 0x683   : > { %v5982_v8 = vpop.f32.mrf.mxu0 }
 0x689   : > { %v4683_v56 = vpop.f32.mrf.mxu0  ;;  %v5984_v12 = vpop.f32.mrf.mxu1 }
 0x68a   : > { %v5986_v17 = vadd.f32 %v4683_v56, %v660_v11 }
 0x68b   : > { %v2339_v25 = vpop.f32.mrf.mxu0  ;;  %v5988_v10 = vpop.f32.mrf.mxu1 }
 0x68c   : > { %v2340_v7 = vadd.f32 %v2339_v25, %v659_v49  ;;  %v2624_v15 = vsel %vm1020_vm2, %v5986_v17, -inf }
 0x68d   : > { %2625 = vmax.xlane.f32.xlu1 %v2624_v15 }
 0x68e   : > { %v2621_v22 = vsel %vm1020_vm2, %v2340_v7, -inf  ;;  %v5993_v26 = vpop.f32.mrf.mxu1 }
 0x68f   : > { %2622 = vmax.xlane.f32.xlu0 %v2621_v22 }
 0x690   : > { %v5995_v46 = vpop.f32.mrf.mxu1 }
 0x691   : > { %v4697_v30 = vpop.f32.mrf.mxu0 }
 0x692   : > { %v2527_v32 = vadd.f32 %v4697_v30, %v660_v11  ;;  %v6041_v30 = vpop.permute.xlu0 %2954 }
 0x693   : > { %v2521_v33 = vpop.f32.mrf.mxu0 }
 0x694   : > { %v2522_v50 = vadd.f32 %v2521_v33, %v659_v49  ;;  %v2636_v31 = vsel %vm1020_vm2, %v2527_v32, -inf }
 0x695   : > { %2637 = vmax.xlane.f32.xlu1 %v2636_v31 }
 0x696   : > { %v4690_v34 = vpop.f32.mrf.mxu1  ;;  %v2633_v54 = vsel %vm1020_vm2, %v2522_v50, -inf  ;;  %v6043_v31 = vpop.permute.xlu0 %3154 }
 0x697   : > { %v2436_v35 = vadd.f32 %v4690_v34, %v660_v11  ;;  %2634 = vmax.xlane.f32.xlu0 %v2633_v54 }
 0x698   : > { %v2430_v40 = vpop.f32.mrf.mxu1 }
 0x699   : > { %v2431_v29 = vadd.f32 %v2430_v40, %v659_v49  ;;  %v2630_v20 = vsel %vm1020_vm2, %v2436_v35, -inf }
 0x69b   : > { %2631 = vmax.xlane.f32.xlu0 %v2630_v20  ;;  %v2627_v48 = vsel %vm1020_vm2, %v2431_v29, -inf }
 0x69e   : > { %v4704_v44 = vpop.f32.mrf.mxu1 }
 0x69f   : > { %v6001_v28 = vadd.f32 %v4704_v44, %v660_v11  ;;  %2628 = vmax.xlane.f32.xlu0 %v2627_v48  ;;  %v2868_v11 = vpop.permute.xlu1 %2867 }
 0x6a0   : > { %v2612_v56 = vpop.f32.mrf.mxu1 }
 0x6a1   : > { %v6003_v25 = vadd.f32 %v2612_v56, %v659_v49  ;;  %v2642_v15 = vsel %vm1020_vm2, %v6001_v28, -inf }
 0x6a2   : > { %2643 = vmax.xlane.f32.xlu1 %v2642_v15 }
 0x6a3   : > { %v2639_v22 = vsel %vm1020_vm2, %v6003_v25, -inf }
 0x6a4   : > { %2640 = vmax.xlane.f32.xlu0 %v2639_v22 }
 0x6b3   : > { %3148 = vrot.lane.b32.xlu1 %v5571_v1, %s5258_s17 }
 0x6b7   : > { %3243 = vrot.lane.b32.xlu1 %v5573_v2, %s5257_s22 }
 0x6ba   : > { %3245 = vrot.lane.b32.xlu0 %v5568_v63, %s5257_s22 }
 0x6bb   : > { %3239 = vrot.lane.b32.xlu1 %v5573_v2, %s5258_s17 }
 0x6be   : > { %3150 = vrot.lane.b32.xlu0 %v5566_v60, %s5258_s17 }
 0x6bf   : > { %3334 = vrot.lane.b32.xlu1 %v5583_v6, %s5257_s22 }
 0x6c2   : > { %3336 = vrot.lane.b32.xlu0 %v5576_v4, %s5257_s22  ;;  %s6353_s22 = scalar_lea.hbm %s6412_s8, %s4392_s5 }
 0x6c3   : > { %3332 = vrot.lane.b32.xlu1 %v5576_v4, %s5258_s17 }
 0x6c6   : > { %3241 = vrot.lane.b32.xlu0 %v5568_v63, %s5258_s17 }
 0x6c7   : > { %3493 = vrot.lane.b32.xlu1 %v5560_v59, %s5259_s16  ;;  %v3064_v59 = vpop.permute.xlu1 %3063 }
 0x6ca   : > { %3330 = vrot.lane.b32.xlu0 %v5583_v6, %s5258_s17  ;;  %s5169_s17 = scalar_lea.vmem %s6358_s20, 1024 }
 0x6cb   : > { %3582 = vrot.lane.b32.xlu1 %v5566_v60, %s5259_s16  ;;  %v3062_v49 = vpop.permute.xlu1 %3061  ;;  %p5170_p7 = scmp.ne.s32.totalorder %s6358_s20, %s5169_s17 }
 0x6cd   : > { %p5171_p12 = pnand %p5170_p7, %p6447_p1 }
 0x6ce   : > { %3495 = vrot.lane.b32.xlu0 %v5558_v57, %s5259_s16  ;;  %v3060_v57 = vpop.permute.xlu0 %3059 }
 0x6cf   : > { %3580 = vrot.lane.b32.xlu1 %v5571_v1, %s5259_s16  ;;  %v3058_v33 = vpop.permute.xlu1 %3057  ;;  %p5172_p9 = pneg %p5171_p12 }
 0x6d2   : > { %3669 = vrot.lane.b32.xlu0 %v5568_v63, %s5259_s16 }
 0x6d3   : > { %3667 = vrot.lane.b32.xlu1 %v5573_v2, %s5259_s16  ;;  %v6045_v60 = vpop.permute.xlu1 %3152 }
 0x716   : > { %v2626_v34 = vpop.xlane.xlu1 %2625 }
 0x717   : > { %v2646_v1 = vsub.f32 %v5986_v17, %v2626_v34 }
 0x718   : > { %v2623_v54 = vpop.xlane.xlu0 %2622 }
 0x719   : > { %v2645_v40 = vsub.f32 %v2340_v7, %v2623_v54  ;;  %v2655_v63 = vmul.f32 1.442695, %v2646_v1 }
 0x71b   : > { %v2653_v20 = vmul.f32 1.442695, %v2645_v40 }
 0x71d   : > { %4959 = vpow2.f32 %v2653_v20 }
 0x71e   : > { %4961 = vpow2.f32 %v2655_v63  ;;  %v2638_v2 = vpop.xlane.xlu1 %2637 }
 0x71f   : > { %v2650_v44 = vsub.f32 %v2527_v32, %v2638_v2 }
 0x720   : > { %v2635_v48 = vpop.xlane.xlu0 %2634 }
 0x721   : > { %v2649_v56 = vsub.f32 %v2522_v50, %v2635_v48  ;;  %v2663_v15 = vmul.f32 1.442695, %v2650_v44 }
 0x723   : > { %v2661_v22 = vmul.f32 1.442695, %v2649_v56 }
 0x724   : > { %v2632_v3 = vpop.xlane.xlu0 %2631 }
 0x725   : > { %4963 = vpow2.f32 %v2661_v22  ;;  %v2648_v9 = vsub.f32 %v2436_v35, %v2632_v3 }
 0x726   : > { %4965 = vpow2.f32 %v2663_v15 }
 0x727   : > { %v2659_v17 = vmul.f32 1.442695, %v2648_v9 }
 0x728   : > { %v2629_v52 = vpop.xlane.xlu0 %2628 }
 0x729   : > { %v2647_v53 = vsub.f32 %v2431_v29, %v2629_v52 }
 0x72a   : > { %v6048_v39 = vpop.eup %4959 }
 0x72b   : > { %v6050_v7 = vpop.eup %4961  ;;  %v2657_v34 = vmul.f32 1.442695, %v2647_v53  ;;  %v2644_v1 = vpop.xlane.xlu1 %2643  ;;  %4709 = vmatprep.mubr.msk.f32.mxu0 %vm1020_vm2, %v6048_v39 }
 0x72c   : > { %v2652_v32 = vsub.f32 %v6001_v28, %v2644_v1  ;;  %4710 = vmatmul.mubr.msk.f32.vlgmr.msra.gmra.mxu0 %vm1020_vm2, %v6050_v7 }
 0x72d   : > { %4967 = vpow2.f32 %v2657_v34  ;;  %4720 = vmatpush3.msra.mxu0 %v5968_v41  ;;  %v2641_v3 = vpop.xlane.xlu0 %2640 }
 0x72e   : > { %4969 = vpow2.f32 %v2659_v17  ;;  %v2651_v52 = vsub.f32 %v6003_v25, %v2641_v3  ;;  %4721 = vmatprep.subr.mxu0 %v2868_v11  ;;  %v2667_v9 = vmul.f32 1.442695, %v2652_v32  ;;  %v662_v17 = vld [vmem:[#allocation8 + $0x38] sm:$0xff]  ;;  %v661_v32 = vld [vmem:[#allocation8 + $0x30] sm:$0xff] }
 0x72f   : > { %v3149_v50 = vpop.permute.xlu1 %3148  ;;  %4722 = vmatpush3.msra.mxu0 %v2868_v11 }
 0x730   : > { %v2665_v53 = vmul.f32 1.442695, %v2651_v52  ;;  %4733 = vmatprep.subr.msk.mxu0 %vm669_vm1, %v3064_v59 }
 0x731   : > { %v3246_v35 = vpop.permute.xlu0 %3245 }
 0x732   : > { %v6060_v29 = vpop.eup %4963  ;;  %4971 = vpow2.f32 %v2665_v53 }
 0x733   : > { %v6062_v28 = vpop.eup %4965  ;;  %4973 = vpow2.f32 %v2667_v9  ;;  %v3244_v54 = vpop.permute.xlu1 %3243  ;;  %4723 = vmatprep.mubr.msk.f32.mxu0 %vm1020_vm2, %v6060_v29 }
 0x734   : > { %4724 = vmatmul.mubr.msk.f32.vlgmr.msra.gmra.mxu0 %vm1020_vm2, %v6062_v28 }
 0x735   : > { %4734 = vmatpush3.xpose.msk.msra.mxu0 %vm669_vm1, %v3064_v59  ;;  %v3151_v41 = vpop.permute.xlu0 %3150  ;;  %4737 = vmatprep.mubr.msk.f32.mxu0 %vm669_vm1, %v3058_v33 }
 0x736   : > { %4735 = vmatprep.subr.msk.mxu0 %vm669_vm1, %v3062_v49 }
 0x737   : > { %v3240_v25 = vpop.permute.xlu1 %3239 }
 0x739   : > { %4736 = vmatpush3.xpose.msk.msra.mxu0 %vm669_vm1, %v3062_v49  ;;  %v3337_v11 = vpop.permute.xlu0 %3336 }
 0x73a   : > { %v6072_v40 = vpop.eup %4967  ;;  %4747 = vmatprep.subr.msk.mxu0 %vm669_vm1, %v3246_v35 }
 0x73b   : > { %v6075_v63 = vpop.eup %4969  ;;  %v3335_v20 = vpop.permute.xlu1 %3334  ;;  %4716 = vmatprep.mubr.msk.f32.mxu1 %vm1020_vm2, %v6072_v40 }
 0x73c   : > { %4738 = vmatmul.mubr.msk.f32.vlgmr.msra.gmra.mxu0 %vm669_vm1, %v3060_v57  ;;  %4717 = vmatmul.mubr.msk.f32.vlgmr.msra.gmra.mxu1 %vm1020_vm2, %v6075_v63 }
 0x73d   : > { %4727 = vmatpush3.msra.mxu1 %v5973_v58  ;;  %4748 = vmatpush3.xpose.msk.msra.mxu0 %vm669_vm1, %v3246_v35  ;;  %v3242_v59 = vpop.permute.xlu0 %3241 }
 0x73e   : > { %4751 = vmatprep.mubr.msk.f32.mxu0 %vm669_vm1, %v3240_v25  ;;  %4728 = vmatprep.subr.mxu1 %v6041_v30 }
 0x73f   : > { %v6086_v49 = vpop.eup %4971  ;;  %4749 = vmatprep.subr.msk.mxu0 %vm669_vm1, %v3244_v54  ;;  %4729 = vmatpush3.msra.mxu1 %v6041_v30  ;;  %v3333_v57 = vpop.permute.xlu1 %3332 }
 0x740   : > { %v6090_v33 = vpop.eup %4973  ;;  %4730 = vmatprep.mubr.msk.f32.mxu1 %vm1020_vm2, %v6086_v49  ;;  %4740 = vmatprep.subr.msk.mxu1 %vm669_vm1, %v6043_v31 }
 0x741   : > { %4731 = vmatmul.mubr.msk.f32.vlgmr.msra.gmra.mxu1 %vm1020_vm2, %v6090_v33  ;;  %4750 = vmatpush3.xpose.msk.msra.mxu0 %vm669_vm1, %v3244_v54  ;;  %v3331_v58 = vpop.permute.xlu0 %3330 }
 0x742   : > { %4741 = vmatpush3.xpose.msk.msra.mxu1 %vm669_vm1, %v6043_v31  ;;  %4744 = vmatprep.mubr.msk.f32.mxu1 %vm669_vm1, %v3149_v50 }
 0x743   : > { %4742 = vmatprep.subr.msk.mxu1 %vm669_vm1, %v6045_v60  ;;  %v3494_v2 = vpop.permute.xlu1 %3493 }
 0x744   : > { %4752 = vmatmul.mubr.msk.f32.vlgmr.msra.gmra.mxu0 %vm669_vm1, %v3242_v59 }
 0x745   : > { %v3496_v30 = vpop.permute.xlu0 %3495 }
 0x746   : > { %4743 = vmatpush3.xpose.msk.msra.mxu1 %vm669_vm1, %v6045_v60  ;;  %4761 = vmatprep.subr.mxu0 %v3496_v30 }
 0x747   : > { %4754 = vmatprep.subr.msk.mxu1 %vm669_vm1, %v3337_v11  ;;  %4762 = vmatpush3.msra.mxu0 %v3496_v30  ;;  %v3583_v44 = vpop.permute.xlu1 %3582 }
 0x748   : > { %4763 = vmatprep.subr.mxu0 %v3494_v2 }
 0x749   : > { %4745 = vmatmul.mubr.msk.f32.vlgmr.msra.gmra.mxu1 %vm669_vm1, %v3151_v41  ;;  %4764 = vmatpush3.msra.mxu0 %v3494_v2  ;;  %v6109_v31 = vpop.permute.xlu0 %3669 }
 0x74a   : > { %4755 = vmatpush3.xpose.msk.msra.mxu1 %vm669_vm1, %v3337_v11  ;;  %4758 = vmatprep.mubr.msk.f32.mxu1 %vm669_vm1, %v3331_v58 }
 0x74b   : > { %4756 = vmatprep.subr.msk.mxu1 %vm669_vm1, %v3335_v20  ;;  %4775 = vmatprep.subr.mxu0 %v6109_v31  ;;  %v3581_v60 = vpop.permute.xlu1 %3580 }
 0x74e   : > { %4757 = vmatpush3.xpose.msk.msra.mxu1 %vm669_vm1, %v3335_v20 }
 0x74f   : > { %4768 = vmatprep.subr.mxu1 %v3583_v44 }
 0x751   : > { %4759 = vmatmul.mubr.msk.f32.vlgmr.msra.gmra.mxu1 %vm669_vm1, %v3333_v57 }
 0x752   : > { %4769 = vmatpush3.msra.mxu1 %v3583_v44 }
 0x753   : > { %4770 = vmatprep.subr.mxu1 %v3581_v60 }
 0x754   : > { %4771 = vmatpush3.msra.mxu1 %v3581_v60 }
 0x7ec   : > { %v6117_v48 = vpop.f32.mrf.mxu0 }
 0x7ee   : > { %v6119_v56 = vpop.f32.mrf.mxu0 }
 0x7f4   : > { %v6121_v15 = vpop.f32.mrf.mxu0 }
 0x7f6   : > { %v6123_v22 = vpop.f32.mrf.mxu0 }
 0x7fc   : > { %v4739_v34 = vpop.f32.mrf.mxu0  ;;  %v6125_v1 = vpop.f32.mrf.mxu1 }
 0x7fd   : > { %v6127_v3 = vadd.f32 %v4739_v34, %v662_v17 }
 0x7fe   : > { %v3139_v52 = vpop.f32.mrf.mxu0  ;;  %v6131_v50 = vpop.f32.mrf.mxu1 }
 0x7ff   : > { %v6129_v9 = vadd.f32 %v3139_v52, %v661_v32  ;;  %v3424_v53 = vsel %vm1020_vm2, %v6127_v3, -inf }
 0x800   : > { %3425 = vmax.xlane.f32.xlu1 %v3424_v53 }
 0x801   : > { %v3421_v35 = vsel %vm1020_vm2, %v6129_v9, -inf  ;;  %v6137_v54 = vpop.f32.mrf.mxu1 }
 0x802   : > { %3422 = vmax.xlane.f32.xlu0 %v3421_v35 }
 0x803   : > { %v6141_v20 = vpop.f32.mrf.mxu1 }
 0x804   : > { %v4753_v41 = vpop.f32.mrf.mxu0 }
 0x805   : > { %v6139_v25 = vadd.f32 %v4753_v41, %v662_v17 }
 0x806   : > { %v3321_v11 = vpop.f32.mrf.mxu0 }
 0x807   : > { %v6143_v59 = vadd.f32 %v3321_v11, %v661_v32  ;;  %v3436_v57 = vsel %vm1020_vm2, %v6139_v25, -inf }
 0x808   : > { %3437 = vmax.xlane.f32.xlu1 %v3436_v57 }
 0x809   : > { %v4746_v58 = vpop.f32.mrf.mxu1  ;;  %v3433_v30 = vsel %vm1020_vm2, %v6143_v59, -inf }
 0x80a   : > { %v6149_v2 = vadd.f32 %v4746_v58, %v662_v17  ;;  %3434 = vmax.xlane.f32.xlu0 %v3433_v30  ;;  %v1878_v30 = vsel %vm1020_vm2, %v5930_v18, 0.0  ;;  %v2675_v18 = vsel %vm1020_vm2, %v6072_v40, 0.0 }
 0x80b   : > { %v3230_v44 = vpop.f32.mrf.mxu1 }
 0x80c   : > { %v6151_v60 = vadd.f32 %v3230_v44, %v661_v32  ;;  %v3430_v34 = vsel %vm1020_vm2, %v6149_v2, -inf  ;;  %v2669_v44 = vsel %vm1020_vm2, %v6048_v39, 0.0  ;;  %v2684_v39 = vsel %vm1020_vm2, %v6062_v28, 0.0 }
 0x80d   : > { %v1887_v28 = vsel %vm1020_vm2, %v5942_v23, 0.0 }
 0x80e   : > { %3431 = vmax.xlane.f32.xlu0 %v3430_v34  ;;  %v3427_v53 = vsel %vm1020_vm2, %v6151_v60, -inf }
 0x811   : > { %v4760_v52 = vpop.f32.mrf.mxu1 }
 0x812   : > { %v6157_v35 = vadd.f32 %v4760_v52, %v662_v17  ;;  %3428 = vmax.xlane.f32.xlu0 %v3427_v53  ;;  %v1872_v17 = vsel %vm1020_vm2, %v5904_v24, 0.0  ;;  %v1875_v24 = vsel %vm1020_vm2, %v5926_v47, 0.0  ;;  %v2681_v47 = vsel %vm1020_vm2, %v6060_v29, 0.0 }
 0x813   : > { %v3412_v41 = vpop.f32.mrf.mxu1 }
 0x814   : > { %v6159_v11 = vadd.f32 %v3412_v41, %v661_v32  ;;  %v3442_v57 = vsel %vm1020_vm2, %v6157_v35, -inf  ;;  %v1869_v32 = vsel %vm1020_vm2, %v5902_v13, 0.0  ;;  %v1884_v13 = vsel %vm1020_vm2, %v5916_v27, 0.0 }
 0x815   : > { %3443 = vmax.xlane.f32.xlu1 %v3442_v57  ;;  %v1881_v27 = vsel %vm1020_vm2, %v5914_v16, 0.0 }
 0x816   : > { %v3439_v58 = vsel %vm1020_vm2, %v6159_v11, -inf }
 0x817   : > { %3440 = vmax.xlane.f32.xlu0 %v3439_v58 }
 0x826   : > { %3754 = vrot.lane.b32.xlu1 %v5583_v6, %s5259_s16  ;;  %v2678_v6 = vsel %vm1020_vm2, %v6075_v63, 0.0  ;;  %v3668_v63 = vpop.permute.xlu1 %3667 }
 0x82d   : > { %3756 = vrot.lane.b32.xlu0 %v5576_v4, %s5259_s16  ;;  %v2672_v4 = vsel %vm1020_vm2, %v6050_v7, 0.0  ;;  %v1890_v7 = vsel %vm1020_vm2, %v5946_v55, 0.0  ;;  %s5263_s16 = smov [#allocation10]  }
 0x84a   : > { %1873 = vadd.xlane.f32.xlu1 %v1872_v17 }
 0x84c   : > { %1870 = vadd.xlane.f32.xlu0 %v1869_v32 }
 0x84e   : > { %1879 = vadd.xlane.f32.xlu1 %v1878_v30 }
 0x850   : > { %2670 = vadd.xlane.f32.xlu0 %v2669_v44 }
 0x852   : > { %2679 = vadd.xlane.f32.xlu1 %v2678_v6 }
 0x854   : > { %2673 = vadd.xlane.f32.xlu0 %v2672_v4 }
 0x856   : > { %1885 = vadd.xlane.f32.xlu1 %v1884_v13 }
 0x858   : > { %1876 = vadd.xlane.f32.xlu0 %v1875_v24 }
 0x85a   : > { %2685 = vadd.xlane.f32.xlu1 %v2684_v39 }
 0x85c   : > { %2676 = vadd.xlane.f32.xlu0 %v2675_v18 }
 0x85e   : > { %1891 = vadd.xlane.f32.xlu1 %v1890_v7 }
 0x860   : > { %1882 = vadd.xlane.f32.xlu0 %v1881_v27 }
 0x864   : > { %2682 = vadd.xlane.f32.xlu0 %v2681_v47 }
 0x868   : > { %1888 = vadd.xlane.f32.xlu0 %v1887_v28 }
 0x889   : > { %v3426_v34 = vpop.xlane.xlu1 %3425 }
 0x88a   : > { %v3446_v40 = vsub.f32 %v6127_v3, %v3426_v34 }
 0x88b   : > { %v3423_v52 = vpop.xlane.xlu0 %3422 }
 0x88c   : > { %v3455_v53 = vmul.f32 1.442695, %v3446_v40  ;;  %v3445_v55 = vsub.f32 %v6129_v9, %v3423_v52  ;;  %v2690_v40 = vsel %vm1020_vm2, %v6090_v33, 0.0  ;;  %v2687_v33 = vsel %vm1020_vm2, %v6086_v49, 0.0 }
 0x88d   : > { %v1084_v49 = vsel %vm1020_vm2, %v5740_v37, 0.0 }
 0x88e   : > { %4975 = vpow2.f32 %v3455_v53  ;;  %v3453_v41 = vmul.f32 1.442695, %v3445_v55 }
 0x890   : > { %4977 = vpow2.f32 %v3453_v41 }
 0x891   : > { %v3438_v16 = vpop.xlane.xlu1 %3437 }
 0x892   : > { %v3450_v57 = vsub.f32 %v6139_v25, %v3438_v16 }
 0x893   : > { %v3435_v29 = vpop.xlane.xlu0 %3434 }
 0x894   : > { %v3463_v58 = vmul.f32 1.442695, %v3450_v57  ;;  %v3449_v17 = vsub.f32 %v6143_v59, %v3435_v29  ;;  %v1072_v57 = vsel %vm1020_vm2, %v5727_v19, 0.0  ;;  %v1090_v19 = vsel %vm1020_vm2, %v5770_v45, 0.0 }
 0x896   : > { %4979 = vpow2.f32 %v3463_v58  ;;  %v3461_v23 = vmul.f32 1.442695, %v3449_v17  ;;  %v1078_v58 = vsel %vm1020_vm2, %v5754_v43, 0.0  ;;  %v1069_v17 = vsel %vm1020_vm2, %v5725_v14, 0.0 }
 0x897   : > { %v3432_v32 = vpop.xlane.xlu0 %3431  ;;  %v1081_v43 = vsel %vm1020_vm2, %v5738_v36, 0.0  ;;  %v1087_v14 = vsel %vm1020_vm2, %v5764_v21, 0.0 }
 0x898   : > { %4981 = vpow2.f32 %v3461_v23  ;;  %v3448_v3 = vsub.f32 %v6149_v2, %v3432_v32  ;;  %v1075_v23 = vsel %vm1020_vm2, %v5750_v42, 0.0 }
 0x89a   : > { %v3459_v30 = vmul.f32 1.442695, %v3448_v3 }
 0x89b   : > { %v4976_v44 = vpop.eup %4975  ;;  %v3429_v6 = vpop.xlane.xlu0 %3428 }
 0x89c   : > { %4983 = vpow2.f32 %v3459_v30  ;;  %v3447_v9 = vsub.f32 %v6151_v60, %v3429_v6  ;;  %v3472_v4 = vsel %vm1020_vm2, %v4976_v44, 0.0 }
 0x89d   : > { %v4978_v13 = vpop.eup %4977  ;;  %3473 = vadd.xlane.f32.xlu1 %v3472_v4 }
 0x89e   : > { %v3457_v25 = vmul.f32 1.442695, %v3447_v9  ;;  %v3444_v24 = vpop.xlane.xlu1 %3443  ;;  %4765 = vmatprep.mubr.msk.f32.mxu0 %vm1020_vm2, %v4978_v13  ;;  %v3469_v59 = vsel %vm1020_vm2, %v4978_v13, 0.0 }
 0x89f   : > { %v3452_v39 = vsub.f32 %v6157_v35, %v3444_v24  ;;  %4766 = vmatmul.mubr.msk.f32.vlgmr.msra.gmra.mxu0 %vm1020_vm2, %v4976_v44  ;;  %3470 = vadd.xlane.f32.xlu0 %v3469_v59 }
 0x8a0   : > { %4985 = vpow2.f32 %v3457_v25  ;;  %4776 = vmatpush3.msra.mxu0 %v6109_v31  ;;  %v3441_v2 = vpop.xlane.xlu0 %3440 }
 0x8a1   : > { %v3467_v60 = vmul.f32 1.442695, %v3452_v39  ;;  %v3451_v18 = vsub.f32 %v6159_v11, %v3441_v2  ;;  %4777 = vmatprep.subr.mxu0 %v3668_v63 }
 0x8a2   : > { %4778 = vmatpush3.msra.mxu0 %v3668_v63  ;;  %v3755_v55 = vpop.permute.xlu1 %3754 }
 0x8a3   : > { %v4980_v7 = vpop.eup %4979  ;;  %4987 = vpow2.f32 %v3467_v60  ;;  %v3465_v27 = vmul.f32 1.442695, %v3451_v18 }
 0x8a4   : > { %v3757_v47 = vpop.permute.xlu0 %3756  ;;  %v3484_v28 = vsel %vm1020_vm2, %v4980_v7, 0.0 }
 0x8a5   : > { %v4982_v34 = vpop.eup %4981  ;;  %4989 = vpow2.f32 %v3465_v27  ;;  %4782 = vmatprep.subr.mxu1 %v3757_v47  ;;  %3485 = vadd.xlane.f32.xlu1 %v3484_v28 }
 0x8a6   : > { %4779 = vmatprep.mubr.msk.f32.mxu0 %vm1020_vm2, %v4982_v34  ;;  %v3481_v31 = vsel %vm1020_vm2, %v4982_v34, 0.0 }
 0x8a7   : > { %4780 = vmatmul.mubr.msk.f32.vlgmr.msra.gmra.mxu0 %vm1020_vm2, %v4980_v7  ;;  %3482 = vadd.xlane.f32.xlu0 %v3481_v31 }
 0x8a9   : > { %v4984_v35 = vpop.eup %4983 }
 0x8aa   : > { %v3478_v11 = vsel %vm1020_vm2, %v4984_v35, 0.0 }
 0x8ab   : > { %3479 = vadd.xlane.f32.xlu1 %v3478_v11 }
 0x8ad   : > { %v4986_v63 = vpop.eup %4985 }
 0x8ae   : > { %4772 = vmatprep.mubr.msk.f32.mxu1 %vm1020_vm2, %v4986_v63  ;;  %v3475_v52 = vsel %vm1020_vm2, %v4986_v63, 0.0 }
 0x8af   : > { %2691 = vadd.xlane.f32.xlu1 %v2690_v40  ;;  %4773 = vmatmul.mubr.msk.f32.vlgmr.msra.gmra.mxu1 %vm1020_vm2, %v4984_v35 }
 0x8b0   : > { %v4988_v53 = vpop.eup %4987  ;;  %3476 = vadd.xlane.f32.xlu0 %v3475_v52  ;;  %4783 = vmatpush3.msra.mxu1 %v3757_v47  ;;  %v3981_v52 = vld [vmem:[#allocation7 + $0x18] sm:$0xff] }
 0x8b1   : > { %4784 = vmatprep.subr.mxu1 %v3755_v55  ;;  %v3490_v16 = vsel %vm1020_vm2, %v4988_v53, 0.0  ;;  %4789 = vmatprep.subr.mxu0 %v3981_v52 }
 0x8b2   : > { %v4990_v41 = vpop.eup %4989  ;;  %4785 = vmatpush3.msra.mxu1 %v3755_v55  ;;  %v3980_v55 = vld [vmem:[#allocation7 + $0x10] sm:$0xff]  ;;  %4790 = vmatpush3.msra.mxu0 %v3981_v52 }
 0x8b3   : > { %4786 = vmatprep.mubr.msk.f32.mxu1 %vm1020_vm2, %v4990_v41  ;;  %3491 = vadd.xlane.f32.xlu1 %v3490_v16  ;;  %v3487_v29 = vsel %vm1020_vm2, %v4990_v41, 0.0  ;;  %v3979_v16 = vld [vmem:[#allocation7 + $0x8] sm:$0xff] }
 0x8b4   : > { %2688 = vadd.xlane.f32.xlu0 %v2687_v33  ;;  %4787 = vmatmul.mubr.msk.f32.vlgmr.msra.gmra.mxu1 %vm1020_vm2, %v4988_v53 }
 0x8b5   : > { %4791 = vmatprep.subr.mxu0 %v3980_v55 }
 0x8b6   : > { %4792 = vmatpush3.msra.mxu0 %v3980_v55 }
 0x8b7   : > { %1073 = vadd.xlane.f32.xlu1 %v1072_v57  ;;  %4793 = vmatprep.subr.mxu0 %v3979_v16  ;;  %v3978_v57 = vld [vmem:[#allocation7] sm:$0xff] }
 0x8b8   : > { %3488 = vadd.xlane.f32.xlu0 %v3487_v29  ;;  %4794 = vmatpush3.msra.mxu0 %v3979_v16 }
 0x8b9   : > { %4795 = vmatprep.subr.mxu0 %v3978_v57 }
 0x8ba   : > { %4796 = vmatpush3.msra.mxu0 %v3978_v57 }
 0x8bb   : > { %1079 = vadd.xlane.f32.xlu1 %v1078_v58 }
 0x8bc   : > { %1070 = vadd.xlane.f32.xlu0 %v1069_v17 }
 0x8bf   : > { %1085 = vadd.xlane.f32.xlu1 %v1084_v49 }
 0x8c0   : > { %1076 = vadd.xlane.f32.xlu0 %v1075_v23 }
 0x8c3   : > { %1091 = vadd.xlane.f32.xlu1 %v1090_v19 }
 0x8c4   : > { %1082 = vadd.xlane.f32.xlu0 %v1081_v43 }
 0x8c8   : > { %1088 = vadd.xlane.f32.xlu0 %v1087_v14 }
 0x8d3   : > { %v1874_v32 = vpop.xlane.xlu1 %1873 }
 0x8d4   : > { %4991 = vrcp.f32 %v1874_v32 }
 0x8d5   : > { %v1871_v37 = vpop.xlane.xlu0 %1870 }
 0x8d6   : > { %4993 = vrcp.f32 %v1871_v37 }
 0x8d7   : > { %v1880_v3 = vpop.xlane.xlu1 %1879 }
 0x8d9   : > { %v2671_v30 = vpop.xlane.xlu0 %2670 }
 0x8da   : > { %4995 = vrcp.f32 %v2671_v30 }
 0x8db   : > { %v2680_v42 = vpop.xlane.xlu1 %2679 }
 0x8dd   : > { %v2674_v44 = vpop.xlane.xlu0 %2673 }
 0x8de   : > { %4997 = vrcp.f32 %v2674_v44 }
 0x8df   : > { %4999 = vrcp.f32 %v1880_v3  ;;  %v1886_v6 = vpop.xlane.xlu1 %1885 }
 0x8e1   : > { %v4992_v45 = vpop.eup %4991  ;;  %v1877_v9 = vpop.xlane.xlu0 %1876 }
 0x8e2   : > { %5001 = vrcp.f32 %v1877_v9  ;;  %v2250_v36 = vmul.f32 %v4992_v45, %v5976_v62 }
 0x8e3   : > { %v4994_v4 = vpop.eup %4993  ;;  %5003 = vrcp.f32 %v2680_v42  ;;  %v2686_v24 = vpop.xlane.xlu1 %2685 }
 0x8e4   : > { %3867 = vrot.lane.b32.xlu1 %v2250_v36, %s5260_s15  ;;  %v2249_v21 = vmul.f32 %v4994_v4, %v5978_v0 }
 0x8e5   : > { %v2677_v13 = vpop.xlane.xlu0 %2676 }
 0x8e6   : > { %5005 = vrcp.f32 %v2677_v13  ;;  %3865 = vrot.lane.b32.xlu0 %v2249_v21, %s5260_s15 }
 0x8e7   : > { %v4996_v25 = vpop.eup %4995  ;;  %5007 = vrcp.f32 %v1886_v6  ;;  %v1892_v0 = vpop.xlane.xlu1 %1891 }
 0x8e8   : > { %v3049_v59 = vmul.f32 %v4996_v25, %v6119_v56 }
 0x8e9   : > { %v1883_v39 = vpop.xlane.xlu0 %1882 }
 0x8ea   : > { %5009 = vrcp.f32 %v1883_v39  ;;  %3897 = vrot.lane.b32.xlu1 %v3049_v59, %s5261_s19 }
 0x8eb   : > { %v4998_v62 = vpop.eup %4997  ;;  %5011 = vrcp.f32 %v2686_v24 }
 0x8ec   : > { %v3050_v2 = vmul.f32 %v4998_v62, %v6117_v48  ;;  %v5000_v60 = vpop.eup %4999 }
 0x8ed   : > { %v2683_v18 = vpop.xlane.xlu0 %2682  ;;  %v2252_v27 = vmul.f32 %v5000_v60, %v5984_v12 }
 0x8ee   : > { %5013 = vrcp.f32 %v2683_v18  ;;  %3899 = vrot.lane.b32.xlu1 %v3050_v2, %s5261_s19 }
 0x8ef   : > { %v5002_v7 = vpop.eup %5001  ;;  %5015 = vrcp.f32 %v1892_v0 }
 0x8f0   : > { %v2251_v56 = vmul.f32 %v5002_v7, %v5988_v10  ;;  %v5004_v47 = vpop.eup %5003 }
 0x8f1   : > { %v1889_v28 = vpop.xlane.xlu0 %1888  ;;  %v3052_v34 = vmul.f32 %v5004_v47, %v6125_v1 }
 0x8f2   : > { %5017 = vrcp.f32 %v1889_v28  ;;  %3871 = vrot.lane.b32.xlu1 %v2252_v27, %s5260_s15  ;;  %3869 = vrot.lane.b32.xlu0 %v2251_v56, %s5260_s15 }
 0x8f3   : > { %v5006_v48 = vpop.eup %5005 }
 0x8f4   : > { %v3051_v31 = vmul.f32 %v5006_v48, %v6131_v50  ;;  %v5008_v35 = vpop.eup %5007 }
 0x8f5   : > { %v2254_v10 = vmul.f32 %v5008_v35, %v5980_v5 }
 0x8f6   : > { %3903 = vrot.lane.b32.xlu1 %v3052_v34, %s5261_s19  ;;  %3901 = vrot.lane.b32.xlu0 %v3051_v31, %s5261_s19 }
 0x8f7   : > { %v5010_v12 = vpop.eup %5009 }
 0x8f8   : > { %v2253_v11 = vmul.f32 %v5010_v12, %v5982_v8  ;;  %v5012_v63 = vpop.eup %5011 }
 0x8f9   : > { %v3054_v1 = vmul.f32 %v5012_v63, %v6121_v15 }
 0x8fa   : > { %3875 = vrot.lane.b32.xlu1 %v2254_v10, %s5260_s15  ;;  %3873 = vrot.lane.b32.xlu0 %v2253_v11, %s5260_s15 }
 0x8fb   : > { %v5014_v40 = vpop.eup %5013 }
 0x8fc   : > { %v3053_v50 = vmul.f32 %v5014_v40, %v6123_v22  ;;  %v5016_v53 = vpop.eup %5015 }
 0x8fd   : > { %v2256_v8 = vmul.f32 %v5016_v53, %v5993_v26 }
 0x8fe   : > { %3907 = vrot.lane.b32.xlu1 %v3054_v1, %s5261_s19  ;;  %3905 = vrot.lane.b32.xlu0 %v3053_v50, %s5261_s19 }
 0x8ff   : > { %v5018_v5 = vpop.eup %5017 }
 0x900   : > { %v2255_v41 = vmul.f32 %v5018_v5, %v5995_v46 }
 0x902   : > { %3879 = vrot.lane.b32.xlu1 %v2256_v8, %s5260_s15  ;;  %3877 = vrot.lane.b32.xlu0 %v2255_v41, %s5260_s15 }
 0x926   : > { %v3474_v15 = vpop.xlane.xlu1 %3473 }
 0x927   : > { %5019 = vrcp.f32 %v3474_v15 }
 0x928   : > { %v3471_v22 = vpop.xlane.xlu0 %3470 }
 0x929   : > { %5021 = vrcp.f32 %v3471_v22 }
 0x92e   : > { %v3486_v33 = vpop.xlane.xlu1 %3485 }
 0x92f   : > { %5023 = vrcp.f32 %v3486_v33 }
 0x930   : > { %v3483_v29 = vpop.xlane.xlu0 %3482 }
 0x931   : > { %5025 = vrcp.f32 %v3483_v29 }
 0x934   : > { %v3480_v26 = vpop.xlane.xlu1 %3479  ;;  %v5020_v58 = vpop.eup %5019 }
 0x935   : > { %5027 = vrcp.f32 %v3480_v26 }
 0x936   : > { %v5022_v19 = vpop.eup %5021 }
 0x938   : > { %v2692_v49 = vpop.xlane.xlu1 %2691 }
 0x939   : > { %v3477_v46 = vpop.xlane.xlu0 %3476  ;;  %5029 = vrcp.f32 %v2692_v49 }
 0x93a   : > { %5031 = vrcp.f32 %v3477_v46 }
 0x93c   : > { %v5024_v37 = vpop.eup %5023  ;;  %v3492_v3 = vpop.xlane.xlu1 %3491 }
 0x93d   : > { %v2689_v32 = vpop.xlane.xlu0 %2688 }
 0x93e   : > { %5033 = vrcp.f32 %v2689_v32  ;;  %v5026_v44 = vpop.eup %5025 }
 0x93f   : > { %5035 = vrcp.f32 %v3492_v3  ;;  %v6442_v3 = vld [vmem:[#allocation17_spill] sm:$0xff] }
 0x940   : > { %v1074_v47 = vpop.xlane.xlu1 %1073 }
 0x941   : > { %v3489_v45 = vpop.xlane.xlu0 %3488 }
 0x942   : > { %5037 = vrcp.f32 %v3489_v45  ;;  %v5028_v36 = vpop.eup %5027 }
 0x944   : > { %v1080_v28 = vpop.xlane.xlu1 %1079 }
 0x945   : > { %v1071_v34 = vpop.xlane.xlu0 %1070 }
 0x946   : > { %v5030_v21 = vpop.eup %5029  ;;  %5039 = vrcp.f32 %v1071_v34 }
 0x947   : > { %v5032_v25 = vpop.eup %5031  ;;  %v3056_v2 = vmul.f32 %v5030_v21, %v6137_v54  ;;  %5041 = vrcp.f32 %v1074_v47  ;;  %v6445_v47 = vld [vmem:[#allocation19_spill] sm:$0xff] }
 0x948   : > { %v1086_v48 = vpop.xlane.xlu1 %1085 }
 0x949   : > { %v1077_v31 = vpop.xlane.xlu0 %1076 }
 0x94a   : > { %5043 = vrcp.f32 %v1077_v31 }
 0x94b   : > { %v5034_v39 = vpop.eup %5033  ;;  %5045 = vrcp.f32 %v1080_v28 }
 0x94c   : > { %v3055_v60 = vmul.f32 %v5034_v39, %v6141_v20  ;;  %v5036_v0 = vpop.eup %5035  ;;  %v1092_v54 = vpop.xlane.xlu1 %1091 }
 0x94d   : > { %v1083_v12 = vpop.xlane.xlu0 %1082 }
 0x94e   : > { %5047 = vrcp.f32 %v1083_v12 }
 0x94f   : > { %v5038_v27 = vpop.eup %5037  ;;  %5049 = vrcp.f32 %v1086_v48  ;;  %v6446_v48 = vld [vmem:[#allocation18_spill] sm:$0xff] }
 0x951   : > { %v1089_v10 = vpop.xlane.xlu0 %1088 }
 0x952   : > { %5051 = vrcp.f32 %v1089_v10 }
 0x953   : > { %v5040_v41 = vpop.eup %5039  ;;  %5053 = vrcp.f32 %v1092_v54 }
 0x954   : > { %v5042_v15 = vpop.eup %5041  ;;  %v1449_v33 = vmul.f32 %v5040_v41, %v5802_v38  ;;  %v5056_v41 = vld [vmem:[%s5463_s21] sm:$0xff] }
 0x955   : > { %v1450_v57 = vmul.f32 %v5042_v15, %v5800_v51 }
 0x956   : > { %v3868_v35 = vpop.permute.xlu1 %3867 }
 0x957   : > { %v3954_v46 = vsel %vm669_vm1, %v1450_v57, %v3868_v35  ;;  %v5044_v51 = vpop.eup %5043  ;;  %v5057_v57 = vld [vmem:[%s5463_s21 + $0x18] sm:$0xff] }
 0x958   : > { %v3866_v63 = vpop.permute.xlu0 %3865 }
 0x959   : > { %v3953_v29 = vsel %vm669_vm1, %v1449_v33, %v3866_v63 }
 0x95c   : > { %v3898_v20 = vpop.permute.xlu1 %3897 }
 0x95f   : > { %v4767_v17 = vpop.f32.mrf.mxu0 }
 0x960   : > { %v3850_v23 = vmul.f32 %v5020_v58, %v4767_v17  ;;  %v3900_v11 = vpop.permute.xlu1 %3899  ;;  %v3961_v58 = vsel %vm1020_vm2, %v3953_v29, %v3898_v20 }
 0x961   : > { %v3571_v43 = vpop.f32.mrf.mxu0  ;;  %v3962_v49 = vsel %vm1020_vm2, %v3954_v46, %v3900_v11 }
 0x962   : > { %v3849_v14 = vmul.f32 %v5022_v19, %v3571_v43  ;;  %3931 = vrot.lane.b32.xlu1 %v3850_v23, %s5262_s26  ;;  %v5046_v43 = vpop.eup %5045 }
 0x964   : > { %3929 = vrot.lane.b32.xlu0 %v3849_v14, %s5262_s26  ;;  %v3872_v40 = vpop.permute.xlu1 %3871  ;;  %v3870_v1 = vpop.permute.xlu0 %3869 }
 0x965   : > { %v5048_v14 = vpop.eup %5047 }
 0x967   : > { %v4781_v30 = vpop.f32.mrf.mxu0 }
 0x968   : > { %v3854_v42 = vmul.f32 %v5024_v37, %v4781_v30  ;;  %v3904_v50 = vpop.permute.xlu1 %3903  ;;  %v3902_v52 = vpop.permute.xlu0 %3901  ;;  %v1451_v37 = vmul.f32 %v5044_v51, %v5814_v61  ;;  %v1452_v30 = vmul.f32 %v5046_v43, %v6442_v3 }
 0x969   : > { %v3745_v6 = vpop.f32.mrf.mxu0 }
 0x96a   : > { %v3853_v9 = vmul.f32 %v5026_v44, %v3745_v6  ;;  %3939 = vrot.lane.b32.xlu1 %v3854_v42, %s5262_s26  ;;  %v5050_v44 = vpop.eup %5049  ;;  %v3955_v45 = vsel %vm669_vm1, %v1451_v37, %v3870_v1  ;;  %v6443_v6 = vld [vmem:[#allocation16_spill] sm:$0xff]  ;;  %v4374_v1 = vld [vmem:[%s6410_s6] ss:$0 sm:$0xff] }
 0x96b   : > { %v5052_v61 = vpop.eup %5051 }
 0x96c   : > { %3937 = vrot.lane.b32.xlu0 %v3853_v9, %s5262_s26  ;;  %v3876_v53 = vpop.permute.xlu1 %3875  ;;  %v3874_v55 = vpop.permute.xlu0 %3873  ;;  %v1453_v9 = vmul.f32 %v5048_v14, %v6443_v6  ;;  %v1455_v28 = vmul.f32 %v5052_v61, %v6445_v47  ;;  %v5060_v14 = vld [vmem:[%s5463_s21 + $0x20] sm:$0xff] }
 0x96f   : > { %v4774_v4 = vpop.f32.mrf.mxu1 }
 0x970   : > { %v3852_v13 = vmul.f32 %v5028_v36, %v4774_v4  ;;  %v3908_v5 = vpop.permute.xlu1 %3907  ;;  %v3906_v8 = vpop.permute.xlu0 %3905  ;;  %v3956_v36 = vsel %vm669_vm1, %v1452_v30, %v3872_v40  ;;  %v3963_v4 = vsel %vm1020_vm2, %v3955_v45, %v3902_v52  ;;  %v5061_v30 = vld [vmem:[%s5463_s21 + $0x38] sm:$0xff]  ;;  %v5062_v45 = vld [vmem:[%s5463_s21 + $0x30] sm:$0xff] }
 0x971   : > { %v3658_v24 = vpop.f32.mrf.mxu1 }
 0x972   : > { %v3851_v59 = vmul.f32 %v5032_v25, %v3658_v24  ;;  %3935 = vrot.lane.b32.xlu1 %v3852_v13, %s5262_s26  ;;  %v3964_v13 = vsel %vm1020_vm2, %v3956_v36, %v3904_v50  ;;  %v3957_v25 = vsel %vm669_vm1, %v1453_v9, %v3874_v55  ;;  %v5055_v55 = vld [vmem:[%s5463_s21 + $0x8] sm:$0xff] }
 0x974   : > { %v4788_v62 = vpop.f32.mrf.mxu1  ;;  %3933 = vrot.lane.b32.xlu0 %v3851_v59, %s5262_s26  ;;  %v3880_v22 = vpop.permute.xlu1 %3879  ;;  %v6444_v59 = vld [vmem:[#allocation15_spill] sm:$0xff] }
 0x975   : > { %v3856_v7 = vmul.f32 %v5036_v0, %v4788_v62  ;;  %v3878_v16 = vpop.permute.xlu0 %3877  ;;  %v1454_v39 = vmul.f32 %v5050_v44, %v6444_v59  ;;  %v3965_v62 = vsel %vm1020_vm2, %v3957_v25, %v3906_v8  ;;  %v5054_v0 = vpop.eup %5053 }
 0x976   : > { %3911 = vrot.lane.b32.xlu1 %v3056_v2, %s5261_s19  ;;  %v3832_v18 = vpop.f32.mrf.mxu1  ;;  %v1456_v34 = vmul.f32 %v5054_v0, %v6446_v48  ;;  %v3959_v31 = vsel %vm669_vm1, %v1455_v28, %v3878_v16 }
 0x977   : > { %v3855_v56 = vmul.f32 %v5038_v27, %v3832_v18 }
 0x978   : > { %3909 = vrot.lane.b32.xlu0 %v3055_v60, %s5261_s19  ;;  %v3960_v12 = vsel %vm669_vm1, %v1456_v34, %v3880_v22  ;;  %s5173_s19 = sshll.u32 %s5263_s16, 4  ;;  %s5174_s19 = int_to_ptr.vmem [resolvable:$false] %s5173_s19 }
 0x979   : > { %p5176_p13 = scmp.lt.s32.totalorder %s6358_s20, %s5174_s19 }
 0x97a   : > { %3943 = vrot.lane.b32.xlu1 %v3856_v7, %s5262_s26  ;;  %v3958_v7 = vsel %vm669_vm1, %v1454_v39, %v3876_v53 }
 0x97c   : > { %3941 = vrot.lane.b32.xlu0 %v3855_v56, %s5262_s26  ;;  %v3966_v56 = vsel %vm1020_vm2, %v3958_v7, %v3908_v5  ;;  %s5175_s26 = scalar_lea.vmem %s5174_s19, 2048 }
 0x97d   : > { %p5177_p0 = scmp.lt.s32.totalorder %s5175_s26, %s5169_s17 }
 0x97f   : > { %p5178_p2 = por %p5177_p0, %p5176_p13 }
 0x981   : > { %p5179_p10 = pnand %p5178_p2, %p5172_p9 }
 0x9d4   : > { %v3932_v26 = vpop.permute.xlu1 %3931 }
 0x9d5   : > { %v3971_v38 = vsel %vm3969_vm3, %v3962_v49, %v3932_v26 }
 0x9d6   : > { %v3930_v17 = vpop.permute.xlu0 %3929 }
 0x9d7   : > { %v3970_v23 = vsel %vm3969_vm3, %v3961_v58, %v3930_v17  ;;  %v5058_v58 = vld [vmem:[%s5463_s21 + $0x10] sm:$0xff] }
 0x9d8   : > { %4797 = vmatprep.mubr.msk.f32.mxu0 %vm379_vm0, %v3970_v23 }
 0x9d9   : > { %4798 = vmatmul.mubr.msk.f32.vlgmr.msra.gmra.mxu0 %vm379_vm0, %v3971_v38  ;;  %v5059_v38 = vld [vmem:[%s5463_s21 + $0x28] sm:$0xff] }
 0x9dc   : > { %v3940_v19 = vpop.permute.xlu1 %3939 }
 0x9dd   : > { %v3975_v54 = vsel %vm3969_vm3, %v3966_v56, %v3940_v19 }
 0x9de   : > { %v3938_v32 = vpop.permute.xlu0 %3937 }
 0x9df   : > { %v3974_v18 = vsel %vm3969_vm3, %v3965_v62, %v3938_v32 }
 0x9e4   : > { %v3936_v42 = vpop.permute.xlu1 %3935 }
 0x9e5   : > { %v3973_v2 = vsel %vm3969_vm3, %v3964_v13, %v3936_v42 }
 0x9e6   : > { %v3934_v21 = vpop.permute.xlu0 %3933 }
 0x9e7   : > { %v3972_v24 = vsel %vm3969_vm3, %v3963_v4, %v3934_v21 }
 0x9e8   : > { %v3912_v60 = vpop.permute.xlu1 %3911  ;;  %4800 = vmatprep.mubr.msk.f32.mxu0 %vm379_vm0, %v3972_v24 }
 0x9e9   : > { %4801 = vmatmul.mubr.msk.f32.gmra.mxu0 %vm379_vm0, %v3973_v2  ;;  %v3968_v11 = vsel %vm1020_vm2, %v3960_v12, %v3912_v60 }
 0x9ea   : > { %4803 = vmatprep.mubr.msk.f32.mxu0 %vm379_vm0, %v3974_v18  ;;  %v3910_v27 = vpop.permute.xlu0 %3909 }
 0x9eb   : > { %v3967_v20 = vsel %vm1020_vm2, %v3959_v31, %v3910_v27 }
 0x9ec   : > { %v3944_v35 = vpop.permute.xlu1 %3943 }
 0x9ed   : > { %4804 = vmatmul.mubr.msk.f32.gmra.mxu0 %vm379_vm0, %v3975_v54  ;;  %v3977_v40 = vsel %vm3969_vm3, %v3968_v11, %v3944_v35 }
 0x9ee   : > { %v3942_v10 = vpop.permute.xlu0 %3941 }
 0x9ef   : > { %v3976_v63 = vsel %vm3969_vm3, %v3967_v20, %v3942_v10 }
 0x9f0   : > { %4806 = vmatprep.mubr.msk.f32.mxu0 %vm379_vm0, %v3976_v63 }
 0x9f1   : > { %4807 = vmatmul.mubr.msk.f32.gmra.mxu0 %vm379_vm0, %v3977_v40 }
 0xa99   : > { %v4799_v50 = vpop.f32.mrf.mxu0 }
 0xa9a   : > { %v4085_v52 = vadd.f32 %v4799_v50, %v4374_v1 }
 0xa9b   : > { %v4079_v53 = vpop.f32.mrf.mxu0 }
 0xa9c   : > { %v4119_v5 = vadd.f32 %v5055_v55, %v4085_v52  ;;  %v4080_v8 = vadd.f32 %v4374_v1, %v4079_v53 }
 0xa9e   : > { %4127 = vst.msk [vmem:[%s6328_s14 + $0x8] sm:$0xff] %vm379_vm0, %v4119_v5  ;;  %v4118_v15 = vadd.f32 %v5056_v41, %v4080_v8 }
 0xaa0   : > { %4126 = vst.msk [vmem:[%s6328_s14] sm:$0xff] %vm379_vm0, %v4118_v15 }
 0xaa9   : > { %v4802_v22 = vpop.f32.mrf.mxu0 }
 0xaaa   : > { %v4095_v16 = vadd.f32 %v4802_v22, %v4374_v1 }
 0xaab   : > { %v4089_v33 = vpop.f32.mrf.mxu0 }
 0xaac   : > { %v4121_v29 = vadd.f32 %v5057_v57, %v4095_v16  ;;  %v4090_v26 = vadd.f32 %v4374_v1, %v4089_v33 }
 0xaad   : > { %v4805_v46 = vpop.f32.mrf.mxu0 }
 0xaae   : > { %4129 = vst.msk [vmem:[%s6328_s14 + $0x18] sm:$0xff] %vm379_vm0, %v4121_v29  ;;  %v4120_v17 = vadd.f32 %v5058_v58, %v4090_v26  ;;  %v4105_v49 = vadd.f32 %v4805_v46, %v4374_v1 }
 0xaaf   : > { %v4099_v23 = vpop.f32.mrf.mxu0 }
 0xab0   : > { %4128 = vst.msk [vmem:[%s6328_s14 + $0x10] sm:$0xff] %vm379_vm0, %v4120_v17  ;;  %v4123_v51 = vadd.f32 %v5059_v38, %v4105_v49  ;;  %v4100_v19 = vadd.f32 %v4374_v1, %v4099_v23 }
 0xab1   : > { %v4808_v43 = vpop.f32.mrf.mxu0 }
 0xab2   : > { %4131 = vst.msk [vmem:[%s6328_s14 + $0x28] sm:$0xff] %vm379_vm0, %v4123_v51  ;;  %v4122_v32 = vadd.f32 %v5060_v14, %v4100_v19  ;;  %v4115_v37 = vadd.f32 %v4808_v43, %v4374_v1 }
 0xab3   : > { %v4109_v3 = vpop.f32.mrf.mxu0 }
 0xab4   : > { %4130 = vst.msk [vmem:[%s6328_s14 + $0x20] sm:$0xff] %vm379_vm0, %v4122_v32  ;;  %v4125_v42 = vadd.f32 %v5061_v30, %v4115_v37  ;;  %v4110_v44 = vadd.f32 %v4374_v1, %v4109_v3 }
 0xab6   : > { %4133 = vst.msk [vmem:[%s6328_s14 + $0x38] sm:$0xff] %vm379_vm0, %v4125_v42  ;;  %v4124_v6 = vadd.f32 %v5062_v45, %v4110_v44 }
 0xab8   : > { %4132 = vst.msk [vmem:[%s6328_s14 + $0x30] sm:$0xff] %vm379_vm0, %v4124_v6 }
 0xab9   : > { %5182 = shalt.err (!%p5179_p10)
}
 0xaba   : > { %s5183_s21 = scalar_lea.hbm %s6353_s22, 1024  ;;  %s5187_s14 = scalar_lea.hbm %s6412_s8, 2048 }
 0xabb   : > { %p5184_p6 = scmp.ne.s32.totalorder %s6353_s22, %s5183_s21  ;;  %p5188_p3 = scmp.lt.s32.totalorder %s6353_s22, %s6412_s8 }
 0xabc   : > { %p5189_p11 = scmp.lt.s32.totalorder %s5187_s14, %s5183_s21 }
 0xabd   : > { %p5185_p4 = pnand %p5184_p6, %p6447_p1 }
 0xabe   : > { %p5190_p5 = por %p5189_p11, %p5188_p3 }
 0xabf   : > { %p5186_p8 = pneg %p5185_p4 }
 0xac1   : > { %p5191_p7 = pnand %p5190_p5, %p5186_p8 }
 0xac3   : > { %5194 = shalt.err (!%p5191_p7)
}
 0xac4   : > { %s5264_s13 = smov 128  }
 0xac5   : > { %4831 = dma.vmem_to_hbm [thread:$0]  (%p6447_p1), %s6358_s20, 1024, %s6353_s22, %s4135_s9, %s5264_s13, %s5264_s13, %s5260_s15  }
 0xac6 PF: > { %s4164_s17 = sand.u32 1, %s5229_s27   ;;  %p6448_p12 = scmp.ne.s32.totalorder %s6422_s12, 0 }
 0xac7   : > { %p6449_p9 = scmp.ge.s32.totalorder %s5241_s30, 2  ;;  %s4165_s16 = scalar_lea.sflag [#allocation4], %s4164_s17 }
 0xac9   : > { %p4848_p13 = pnand %p6449_p9, %p6448_p12 }
 0xacb   : > { %p4849_p0 = pneg %p4848_p13 }
 0xacd   : > { %5224 = dma.done.wait (%p4849_p0), %s4165_s16, 1024  }
 0xace   : > { %5226 = vsyncadd (%p4849_p0), %s4165_s16, 4294966272  ;;  %p23_p2 = scmp.ge.s32.totalorder %s5399_s18, 4   ;;  %s6450_s27 = smov %s5233_s28 }
 0xacf   : > { %s6451_s28 = smov %s5237_s29  ;;  %s6452_s29 = smov %s5409_s24 }
 0xad0   : > { %s6453_s30 = smov %s5399_s18  ;;  %25 = sbr.rel (!%p23_p2) target bundleno = 10 (0xa), region = 109 }
 0xad5   :  { %4170 = vsyncpa [#allocation3], 1 }
 0xad6   :  { %4172 = vsyncpa [#allocation3 + $0x1], 1 }
 0xad7   :  { %4173 = vsyncpa [#allocation6], 1 }
 0xad8   :  { %4174 = vsyncpa [#allocation9], 1 }
 0xad9   :  { %4175 = vsyncpa [#allocation4], 1 }
 0xada   :  { %4177 = vsyncpa [#allocation4 + $0x1], 1 }

</bundles_post_ra>
